<compile_context>
chip_gen: v5e
topology: v5e:2x2
jax: 0.10.0
libtpu: 0.0.40
codegen_flags: <defaults>
</compile_context>

<pallas_src>
import jax
import jax.numpy as jnp
from jax.experimental import pallas as pl
from jax.experimental.pallas import tpu as pltpu


def _behavior_encoder_kernel(xe_ref, xo_ref, w1_ref, b1_ref, w2_ref, b2_ref,
                             w3_ref, b3_ref, w4_ref, b4_ref,
                             sel_ref, bl_ref, out_ref):
    f32 = jnp.float32

    def mm(a, w):
        return jnp.dot(a, w, preferred_element_type=f32)

    xe = xe_ref[...]                  # (TB*50, 3): rows 2m of the concatenated length
    xo = xo_ref[...]                  # (TB*50, 3): rows 2m+1
    half = xe.shape[0]                # TB*50
    ne = half - 1                     # conv1 rows computed per parity
    lp = half - 2                     # pooled rows (= conv2 rows / 2)
    l3 = lp - 2                       # conv1d_1 rows
    l4 = l3 - 2                       # conv1d_2 rows

    # Conv2d(1, 16, (3, 3)) + ReLU, produced directly in even/odd phases:
    #   h1[2m]   = relu(x[2m]  @W0 + x[2m+1]@W1 + x[2m+2]@W2 + b)
    #   h1[2m+1] = relu(x[2m+1]@W0 + x[2m+2]@W1 + x[2m+3]@W2 + b)
    b1 = b1_ref[...]
    h1e = jnp.maximum(mm(xe[0:ne], w1_ref[0]) + mm(xo[0:ne], w1_ref[1])
                      + mm(xe[1:ne + 1], w1_ref[2]) + b1, 0.0)
    h1o = jnp.maximum(mm(xo[0:ne], w1_ref[0]) + mm(xe[1:ne + 1], w1_ref[1])
                      + mm(xo[1:ne + 1], w1_ref[2]) + b1, 0.0)

    # Conv2d(16, 32, (3, 1)) + ReLU, fused with MaxPool2d((2, 1)): the even and
    # odd conv2 rows are exactly the two pool operands -> pool is one vector max.
    b2 = b2_ref[...]
    ce = jnp.maximum(mm(h1e[0:lp], w2_ref[0]) + mm(h1o[0:lp], w2_ref[1])
                     + mm(h1e[1:lp + 1], w2_ref[2]) + b2, 0.0)
    co = jnp.maximum(mm(h1o[0:lp], w2_ref[0]) + mm(h1e[1:lp + 1], w2_ref[1])
                     + mm(h1o[1:lp + 1], w2_ref[2]) + b2, 0.0)
    pooled = jnp.maximum(ce, co)                               # (lp, 32)

    # Conv1d(32, 45, 3) + ReLU.
    h3 = jnp.maximum(
        mm(pooled[0:l3], w3_ref[0]) + mm(pooled[1:l3 + 1], w3_ref[1])
        + mm(pooled[2:l3 + 2], w3_ref[2]) + b3_ref[...], 0.0)  # (l3, 45)

    # Conv1d(45, 64, 3) + ReLU.
    h4 = jnp.maximum(
        mm(h3[0:l4], w4_ref[0]) + mm(h3[1:l4 + 1], w4_ref[1])
        + mm(h3[2:l4 + 2], w4_ref[2]) + b4_ref[...], 0.0)      # (l4, 64)

    # Linear(44, 1) for all TB samples at once: block-diagonal selection matmul
    # picks the 44 valid rows of each sample (sample stride = 50 rows) and
    # applies the Linear weights in the same MXU op; cross-sample garbage rows
    # are multiplied by zeros.
    out_ref[...] = mm(sel_ref[...], h4) + bl_ref[...]          # (TB, 64)


def behavior_encoder_forward(x, kparams, *, batch_tile=8):
    (w1k, b1k, w2k, b2k, w3k, b3k, w4k, b4k, wlk, blk) = kparams
    b, h, w = x.shape
    assert w == 3, "conv2 (3,1) + squeeze(3) require input width 3"
    assert h % 2 == 0, "MaxPool2d((2,1)) requires an even conv2 output height"
    hp = h // 2                                   # 50
    lin_len = wlk.shape[1]                        # 44
    assert lin_len == hp - 6, "Linear(44, 1) requires ((H-4)//2 - 4) == 44, i.e. H == 100"
    c4 = w4k.shape[2]                             # 64

    tb = min(batch_tile, b)                       # samples fused per grid step
    bp = ((b + tb - 1) // tb) * tb                # padded batch
    xp = jnp.pad(x, ((0, bp - b), (0, 0), (0, 0))) if bp != b else x

    # Wrapper-side layout plumbing (plain XLA, outside the kernel): split the
    # length axis into even/odd phases and concatenate a tile's samples along
    # length.  Row b*hp + m of x_even is sample b, original row 2m.
    x_even = xp[:, 0::2, :].reshape(bp * hp, w)
    x_odd = xp[:, 1::2, :].reshape(bp * hp, w)

    # Block-diagonal Linear weights: row s carries wl at column offset s*hp.
    l4 = tb * hp - 6
    sel = jnp.zeros((tb, l4), jnp.float32)
    for s in range(tb):
        sel = sel.at[s, s * hp:s * hp + lin_len].set(wlk[0])

    out = pl.pallas_call(
        _behavior_encoder_kernel,
        out_shape=jax.ShapeDtypeStruct((bp, c4), jnp.float32),
        grid_spec=pltpu.PrefetchScalarGridSpec(
            num_scalar_prefetch=0,
            grid=(bp // tb,),
            in_specs=[
                pl.BlockSpec((tb * hp, w), lambda i: (i, 0)),
                pl.BlockSpec((tb * hp, w), lambda i: (i, 0)),
                pl.BlockSpec(w1k.shape, lambda i: (0, 0, 0)),
                pl.BlockSpec(b1k.shape, lambda i: (0, 0)),
                pl.BlockSpec(w2k.shape, lambda i: (0, 0, 0)),
                pl.BlockSpec(b2k.shape, lambda i: (0, 0)),
                pl.BlockSpec(w3k.shape, lambda i: (0, 0, 0)),
                pl.BlockSpec(b3k.shape, lambda i: (0, 0)),
                pl.BlockSpec(w4k.shape, lambda i: (0, 0, 0)),
                pl.BlockSpec(b4k.shape, lambda i: (0, 0)),
                pl.BlockSpec(sel.shape, lambda i: (0, 0)),
                pl.BlockSpec(blk.shape, lambda i: (0, 0)),
            ],
            out_specs=pl.BlockSpec((tb, c4), lambda i: (i, 0)),
        ),
        compiler_params=pltpu.CompilerParams(
            dimension_semantics=("parallel",),
        ),
    )(x_even, x_odd, w1k, b1k, w2k, b2k, w3k, b3k, w4k, b4k, sel, blk)
    return out[:b]


class BehaviorEncoder:
    """JAX/Pallas port of the PyTorch BehaviorEncoder module."""

    def __init__(self, key):
        def uinit(k, shape, fan_in):
            bound = 1.0 / (fan_in ** 0.5)
            return jax.random.uniform(k, shape, jnp.float32, -bound, bound)

        ks = jax.random.split(key, 10)
        # PyTorch-layout parameters (also used by the pure-JAX reference).
        self.w1 = uinit(ks[0], (16, 1, 3, 3), 1 * 3 * 3)
        self.b1 = uinit(ks[1], (16,), 1 * 3 * 3)
        self.w2 = uinit(ks[2], (32, 16, 3, 1), 16 * 3 * 1)
        self.b2 = uinit(ks[3], (32,), 16 * 3 * 1)
        self.w3 = uinit(ks[4], (45, 32, 3), 32 * 3)
        self.b3 = uinit(ks[5], (45,), 32 * 3)
        self.w4 = uinit(ks[6], (64, 45, 3), 45 * 3)
        self.b4 = uinit(ks[7], (64,), 45 * 3)
        self.wl = uinit(ks[8], (1, 44), 44)
        self.bl = uinit(ks[9], (1,), 44)

        # Kernel-layout parameters: weights as (tap, C_in, C_out), biases (1, C).
        self.kparams = (
            jnp.transpose(self.w1, (2, 3, 1, 0))[:, :, 0, :],   # (3, 3, 16)
            self.b1.reshape(1, -1),
            jnp.transpose(self.w2[:, :, :, 0], (2, 1, 0)),      # (3, 16, 32)
            self.b2.reshape(1, -1),
            jnp.transpose(self.w3, (2, 1, 0)),                  # (3, 32, 45)
            self.b3.reshape(1, -1),
            jnp.transpose(self.w4, (2, 1, 0)),                  # (3, 45, 64)
            self.b4.reshape(1, -1),
            self.wl,                                            # (1, 44)
            self.bl.reshape(1, 1),
        )

    def __call__(self, x):
        return behavior_encoder_forward(x, self.kparams)


def _conv2d_valid(x, w, prec):
    return jax.lax.conv_general_dilated(
        x, w, window_strides=(1, 1), padding="VALID",
        dimension_numbers=("NCHW", "OIHW", "NCHW"), precision=prec)


def reference_forward(model, x):
    """Pure-JAX reference with nn.Module semantics (for correctness check)."""
    prec = jax.lax.Precision.HIGHEST
    y = x[:, None, :, :]                                            # (B,1,H,3)
    y = jax.nn.relu(_conv2d_valid(y, model.w1, prec)
                    + model.b1[None, :, None, None])                # (B,16,98,1)
    y = jax.nn.relu(_conv2d_valid(y, model.w2, prec)
                    + model.b2[None, :, None, None])                # (B,32,96,1)
    y = jax.lax.reduce_window(y, -jnp.inf, jax.lax.max,
                              (1, 1, 2, 1), (1, 1, 2, 1), "VALID")  # (B,32,48,1)
    y = y[:, :, :, 0]                                               # (B,32,48)
    y = jax.nn.relu(
        _conv2d_valid(y[..., None], model.w3[..., None], prec)[..., 0]
        + model.b3[None, :, None])                                  # (B,45,46)
    y = jax.nn.relu(
        _conv2d_valid(y[..., None], model.w4[..., None], prec)[..., 0]
        + model.b4[None, :, None])                                  # (B,64,44)
    y = jnp.einsum("bcl,ol->bco", y, model.wl, precision=prec)[..., 0]
    y = y + model.bl[0]                                             # (B,64)
    return y


if __name__ == "__main__":
    key = jax.random.PRNGKey(0)
    k_model, k_x1, k_x2 = jax.random.split(key, 3)

    # Shapes implied by the forward pass: width 3 (conv2 (3,1) + squeeze(3)),
    # height 100 (Linear(44, 1) needs ((H-4)//2 - 4) == 44).
    height, width = 100, 3
    model = BehaviorEncoder(k_model)

    # Small batch: single grid tile, no padding.
    x1 = jax.random.normal(k_x1, (2, height, width), dtype=jnp.float32)
    out1 = jax.block_until_ready(model(x1))
    assert out1.shape == (2, 64), out1.shape
    ref1 = jax.block_until_ready(reference_forward(model, x1))
    assert jnp.allclose(out1, ref1, atol=2e-3, rtol=2e-3), (
        "mismatch vs reference (B=2), max abs diff = "
        f"{float(jnp.max(jnp.abs(out1 - ref1)))}")

    # Larger batch: exercises the multi-tile grid + batch-padding path.
    x2 = jax.random.normal(k_x2, (11, height, width), dtype=jnp.float32)
    out2 = jax.block_until_ready(model(x2))
    assert out2.shape == (11, 64), out2.shape
    ref2 = jax.block_until_ready(reference_forward(model, x2))
    assert jnp.allclose(out2, ref2, atol=2e-3, rtol=2e-3), (
        "mismatch vs reference (B=11), max abs diff = "
        f"{float(jnp.max(jnp.abs(out2 - ref2)))}")

    print("KERNEL_OK")
</pallas_src>

<mosaic_0001>
module attributes {stable_mosaic.version = 11 : i64} {
  func.func @_behavior_encoder_kernel(%arg0: i32, %arg1: memref<100x3xf32, #tpu.memory_space<vmem>>, %arg2: memref<100x3xf32, #tpu.memory_space<vmem>>, %arg3: memref<3x3x16xf32, #tpu.memory_space<vmem>>, %arg4: memref<1x16xf32, #tpu.memory_space<vmem>>, %arg5: memref<3x16x32xf32, #tpu.memory_space<vmem>>, %arg6: memref<1x32xf32, #tpu.memory_space<vmem>>, %arg7: memref<3x32x45xf32, #tpu.memory_space<vmem>>, %arg8: memref<1x45xf32, #tpu.memory_space<vmem>>, %arg9: memref<3x45x64xf32, #tpu.memory_space<vmem>>, %arg10: memref<1x64xf32, #tpu.memory_space<vmem>>, %arg11: memref<2x94xf32, #tpu.memory_space<vmem>>, %arg12: memref<1x1xf32, #tpu.memory_space<vmem>>, %arg13: memref<2x64xf32, #tpu.memory_space<vmem>>) attributes {dimension_semantics = [#tpu.dimension_semantics<parallel>], iteration_bounds = array<i64: 1>, scalar_prefetch = 0 : i64, scratch_operands = 0 : i64, tpu.core_type = #tpu.core_type<tc>, window_params = [{transform_indices = @transform_0, window_bounds = array<i64: 100, 3>}, {transform_indices = @transform_1, window_bounds = array<i64: 100, 3>}, {pipeline_mode = #tpu.pipeline_mode<synchronous>, transform_indices = @transform_2, window_bounds = array<i64: 3, 3, 16>}, {pipeline_mode = #tpu.pipeline_mode<synchronous>, transform_indices = @transform_3, window_bounds = array<i64: 1, 16>}, {pipeline_mode = #tpu.pipeline_mode<synchronous>, transform_indices = @transform_4, window_bounds = array<i64: 3, 16, 32>}, {pipeline_mode = #tpu.pipeline_mode<synchronous>, transform_indices = @transform_5, window_bounds = array<i64: 1, 32>}, {pipeline_mode = #tpu.pipeline_mode<synchronous>, transform_indices = @transform_6, window_bounds = array<i64: 3, 32, 45>}, {pipeline_mode = #tpu.pipeline_mode<synchronous>, transform_indices = @transform_7, window_bounds = array<i64: 1, 45>}, {pipeline_mode = #tpu.pipeline_mode<synchronous>, transform_indices = @transform_8, window_bounds = array<i64: 3, 45, 64>}, {pipeline_mode = #tpu.pipeline_mode<synchronous>, transform_indices = @transform_9, window_bounds = array<i64: 1, 64>}, {pipeline_mode = #tpu.pipeline_mode<synchronous>, transform_indices = @transform_10, window_bounds = array<i64: 2, 94>}, {pipeline_mode = #tpu.pipeline_mode<synchronous>, transform_indices = @transform_11, window_bounds = array<i64: 1, 1>}, {transform_indices = @transform_12, window_bounds = array<i64: 2, 64>}]} {
    %c0 = arith.constant 0 : index
    %c0_0 = arith.constant 0 : index
    %0 = vector.load %arg1[%c0, %c0_0] : memref<100x3xf32, #tpu.memory_space<vmem>>, vector<100x3xf32>
    %c0_1 = arith.constant 0 : index
    %c0_2 = arith.constant 0 : index
    %1 = vector.load %arg2[%c0_1, %c0_2] : memref<100x3xf32, #tpu.memory_space<vmem>>, vector<100x3xf32>
    %c0_3 = arith.constant 0 : index
    %c0_4 = arith.constant 0 : index
    %2 = vector.load %arg4[%c0_3, %c0_4] : memref<1x16xf32, #tpu.memory_space<vmem>>, vector<1x16xf32>
    %3 = vector.extract_strided_slice %0 {offsets = [0, 0], sizes = [99, 3], strides = [1, 1]} : vector<100x3xf32> to vector<99x3xf32>
    %c0_5 = arith.constant 0 : index
    %c0_6 = arith.constant 0 : index
    %c0_7 = arith.constant 0 : index
    %4 = vector.load %arg3[%c0_5, %c0_6, %c0_7] : memref<3x3x16xf32, #tpu.memory_space<vmem>>, vector<1x3x16xf32>
    %5 = vector.shape_cast %4 : vector<1x3x16xf32> to vector<3x16xf32>
    %cst = arith.constant dense<0.000000e+00> : vector<99x16xf32>
    %6 = tpu.matmul %3, %5, %cst {dimension_numbers = #tpu.dot_dimension_numbers<[1], [0], [0], [1], [0, 0, 1, 1], [], []>} : vector<99x3xf32>, vector<3x16xf32>, vector<99x16xf32> -> vector<99x16xf32>
    %7 = vector.extract_strided_slice %1 {offsets = [0, 0], sizes = [99, 3], strides = [1, 1]} : vector<100x3xf32> to vector<99x3xf32>
    %c1 = arith.constant 1 : index
    %c0_8 = arith.constant 0 : index
    %c0_9 = arith.constant 0 : index
    %8 = vector.load %arg3[%c1, %c0_8, %c0_9] : memref<3x3x16xf32, #tpu.memory_space<vmem>>, vector<1x3x16xf32>
    %9 = vector.shape_cast %8 : vector<1x3x16xf32> to vector<3x16xf32>
    %cst_10 = arith.constant dense<0.000000e+00> : vector<99x16xf32>
    %10 = tpu.matmul %7, %9, %cst_10 {dimension_numbers = #tpu.dot_dimension_numbers<[1], [0], [0], [1], [0, 0, 1, 1], [], []>} : vector<99x3xf32>, vector<3x16xf32>, vector<99x16xf32> -> vector<99x16xf32>
    %11 = arith.addf %6, %10 : vector<99x16xf32>
    %12 = vector.extract_strided_slice %0 {offsets = [1, 0], sizes = [99, 3], strides = [1, 1]} : vector<100x3xf32> to vector<99x3xf32>
    %c2 = arith.constant 2 : index
    %c0_11 = arith.constant 0 : index
    %c0_12 = arith.constant 0 : index
    %13 = vector.load %arg3[%c2, %c0_11, %c0_12] : memref<3x3x16xf32, #tpu.memory_space<vmem>>, vector<1x3x16xf32>
    %14 = vector.shape_cast %13 : vector<1x3x16xf32> to vector<3x16xf32>
    %cst_13 = arith.constant dense<0.000000e+00> : vector<99x16xf32>
    %15 = tpu.matmul %12, %14, %cst_13 {dimension_numbers = #tpu.dot_dimension_numbers<[1], [0], [0], [1], [0, 0, 1, 1], [], []>} : vector<99x3xf32>, vector<3x16xf32>, vector<99x16xf32> -> vector<99x16xf32>
    %16 = arith.addf %11, %15 : vector<99x16xf32>
    %17 = vector.broadcast %2 : vector<1x16xf32> to vector<99x16xf32>
    %18 = arith.addf %16, %17 : vector<99x16xf32>
    %cst_14 = arith.constant 0.000000e+00 : f32
    %19 = vector.broadcast %cst_14 : f32 to vector<99x16xf32>
    %20 = arith.maximumf %18, %19 : vector<99x16xf32>
    %21 = vector.extract_strided_slice %1 {offsets = [0, 0], sizes = [99, 3], strides = [1, 1]} : vector<100x3xf32> to vector<99x3xf32>
    %c0_15 = arith.constant 0 : index
    %c0_16 = arith.constant 0 : index
    %c0_17 = arith.constant 0 : index
    %22 = vector.load %arg3[%c0_15, %c0_16, %c0_17] : memref<3x3x16xf32, #tpu.memory_space<vmem>>, vector<1x3x16xf32>
    %23 = vector.shape_cast %22 : vector<1x3x16xf32> to vector<3x16xf32>
    %cst_18 = arith.constant dense<0.000000e+00> : vector<99x16xf32>
    %24 = tpu.matmul %21, %23, %cst_18 {dimension_numbers = #tpu.dot_dimension_numbers<[1], [0], [0], [1], [0, 0, 1, 1], [], []>} : vector<99x3xf32>, vector<3x16xf32>, vector<99x16xf32> -> vector<99x16xf32>
    %25 = vector.extract_strided_slice %0 {offsets = [1, 0], sizes = [99, 3], strides = [1, 1]} : vector<100x3xf32> to vector<99x3xf32>
    %c1_19 = arith.constant 1 : index
    %c0_20 = arith.constant 0 : index
    %c0_21 = arith.constant 0 : index
    %26 = vector.load %arg3[%c1_19, %c0_20, %c0_21] : memref<3x3x16xf32, #tpu.memory_space<vmem>>, vector<1x3x16xf32>
    %27 = vector.shape_cast %26 : vector<1x3x16xf32> to vector<3x16xf32>
    %cst_22 = arith.constant dense<0.000000e+00> : vector<99x16xf32>
    %28 = tpu.matmul %25, %27, %cst_22 {dimension_numbers = #tpu.dot_dimension_numbers<[1], [0], [0], [1], [0, 0, 1, 1], [], []>} : vector<99x3xf32>, vector<3x16xf32>, vector<99x16xf32> -> vector<99x16xf32>
    %29 = arith.addf %24, %28 : vector<99x16xf32>
    %30 = vector.extract_strided_slice %1 {offsets = [1, 0], sizes = [99, 3], strides = [1, 1]} : vector<100x3xf32> to vector<99x3xf32>
    %c2_23 = arith.constant 2 : index
    %c0_24 = arith.constant 0 : index
    %c0_25 = arith.constant 0 : index
    %31 = vector.load %arg3[%c2_23, %c0_24, %c0_25] : memref<3x3x16xf32, #tpu.memory_space<vmem>>, vector<1x3x16xf32>
    %32 = vector.shape_cast %31 : vector<1x3x16xf32> to vector<3x16xf32>
    %cst_26 = arith.constant dense<0.000000e+00> : vector<99x16xf32>
    %33 = tpu.matmul %30, %32, %cst_26 {dimension_numbers = #tpu.dot_dimension_numbers<[1], [0], [0], [1], [0, 0, 1, 1], [], []>} : vector<99x3xf32>, vector<3x16xf32>, vector<99x16xf32> -> vector<99x16xf32>
    %34 = arith.addf %29, %33 : vector<99x16xf32>
    %35 = vector.broadcast %2 : vector<1x16xf32> to vector<99x16xf32>
    %36 = arith.addf %34, %35 : vector<99x16xf32>
    %cst_27 = arith.constant 0.000000e+00 : f32
    %37 = vector.broadcast %cst_27 : f32 to vector<99x16xf32>
    %38 = arith.maximumf %36, %37 : vector<99x16xf32>
    %c0_28 = arith.constant 0 : index
    %c0_29 = arith.constant 0 : index
    %39 = vector.load %arg6[%c0_28, %c0_29] : memref<1x32xf32, #tpu.memory_space<vmem>>, vector<1x32xf32>
    %40 = vector.extract_strided_slice %20 {offsets = [0, 0], sizes = [98, 16], strides = [1, 1]} : vector<99x16xf32> to vector<98x16xf32>
    %c0_30 = arith.constant 0 : index
    %c0_31 = arith.constant 0 : index
    %c0_32 = arith.constant 0 : index
    %41 = vector.load %arg5[%c0_30, %c0_31, %c0_32] : memref<3x16x32xf32, #tpu.memory_space<vmem>>, vector<1x16x32xf32>
    %42 = vector.shape_cast %41 : vector<1x16x32xf32> to vector<16x32xf32>
    %cst_33 = arith.constant dense<0.000000e+00> : vector<98x32xf32>
    %43 = tpu.matmul %40, %42, %cst_33 {dimension_numbers = #tpu.dot_dimension_numbers<[1], [0], [0], [1], [0, 0, 1, 1], [], []>} : vector<98x16xf32>, vector<16x32xf32>, vector<98x32xf32> -> vector<98x32xf32>
    %44 = vector.extract_strided_slice %38 {offsets = [0, 0], sizes = [98, 16], strides = [1, 1]} : vector<99x16xf32> to vector<98x16xf32>
    %c1_34 = arith.constant 1 : index
    %c0_35 = arith.constant 0 : index
    %c0_36 = arith.constant 0 : index
    %45 = vector.load %arg5[%c1_34, %c0_35, %c0_36] : memref<3x16x32xf32, #tpu.memory_space<vmem>>, vector<1x16x32xf32>
    %46 = vector.shape_cast %45 : vector<1x16x32xf32> to vector<16x32xf32>
    %cst_37 = arith.constant dense<0.000000e+00> : vector<98x32xf32>
    %47 = tpu.matmul %44, %46, %cst_37 {dimension_numbers = #tpu.dot_dimension_numbers<[1], [0], [0], [1], [0, 0, 1, 1], [], []>} : vector<98x16xf32>, vector<16x32xf32>, vector<98x32xf32> -> vector<98x32xf32>
    %48 = arith.addf %43, %47 : vector<98x32xf32>
    %49 = vector.extract_strided_slice %20 {offsets = [1, 0], sizes = [98, 16], strides = [1, 1]} : vector<99x16xf32> to vector<98x16xf32>
    %c2_38 = arith.constant 2 : index
    %c0_39 = arith.constant 0 : index
    %c0_40 = arith.constant 0 : index
    %50 = vector.load %arg5[%c2_38, %c0_39, %c0_40] : memref<3x16x32xf32, #tpu.memory_space<vmem>>, vector<1x16x32xf32>
    %51 = vector.shape_cast %50 : vector<1x16x32xf32> to vector<16x32xf32>
    %cst_41 = arith.constant dense<0.000000e+00> : vector<98x32xf32>
    %52 = tpu.matmul %49, %51, %cst_41 {dimension_numbers = #tpu.dot_dimension_numbers<[1], [0], [0], [1], [0, 0, 1, 1], [], []>} : vector<98x16xf32>, vector<16x32xf32>, vector<98x32xf32> -> vector<98x32xf32>
    %53 = arith.addf %48, %52 : vector<98x32xf32>
    %54 = vector.broadcast %39 : vector<1x32xf32> to vector<98x32xf32>
    %55 = arith.addf %53, %54 : vector<98x32xf32>
    %cst_42 = arith.constant 0.000000e+00 : f32
    %56 = vector.broadcast %cst_42 : f32 to vector<98x32xf32>
    %57 = arith.maximumf %55, %56 : vector<98x32xf32>
    %58 = vector.extract_strided_slice %38 {offsets = [0, 0], sizes = [98, 16], strides = [1, 1]} : vector<99x16xf32> to vector<98x16xf32>
    %c0_43 = arith.constant 0 : index
    %c0_44 = arith.constant 0 : index
    %c0_45 = arith.constant 0 : index
    %59 = vector.load %arg5[%c0_43, %c0_44, %c0_45] : memref<3x16x32xf32, #tpu.memory_space<vmem>>, vector<1x16x32xf32>
    %60 = vector.shape_cast %59 : vector<1x16x32xf32> to vector<16x32xf32>
    %cst_46 = arith.constant dense<0.000000e+00> : vector<98x32xf32>
    %61 = tpu.matmul %58, %60, %cst_46 {dimension_numbers = #tpu.dot_dimension_numbers<[1], [0], [0], [1], [0, 0, 1, 1], [], []>} : vector<98x16xf32>, vector<16x32xf32>, vector<98x32xf32> -> vector<98x32xf32>
    %62 = vector.extract_strided_slice %20 {offsets = [1, 0], sizes = [98, 16], strides = [1, 1]} : vector<99x16xf32> to vector<98x16xf32>
    %c1_47 = arith.constant 1 : index
    %c0_48 = arith.constant 0 : index
    %c0_49 = arith.constant 0 : index
    %63 = vector.load %arg5[%c1_47, %c0_48, %c0_49] : memref<3x16x32xf32, #tpu.memory_space<vmem>>, vector<1x16x32xf32>
    %64 = vector.shape_cast %63 : vector<1x16x32xf32> to vector<16x32xf32>
    %cst_50 = arith.constant dense<0.000000e+00> : vector<98x32xf32>
    %65 = tpu.matmul %62, %64, %cst_50 {dimension_numbers = #tpu.dot_dimension_numbers<[1], [0], [0], [1], [0, 0, 1, 1], [], []>} : vector<98x16xf32>, vector<16x32xf32>, vector<98x32xf32> -> vector<98x32xf32>
    %66 = arith.addf %61, %65 : vector<98x32xf32>
    %67 = vector.extract_strided_slice %38 {offsets = [1, 0], sizes = [98, 16], strides = [1, 1]} : vector<99x16xf32> to vector<98x16xf32>
    %c2_51 = arith.constant 2 : index
    %c0_52 = arith.constant 0 : index
    %c0_53 = arith.constant 0 : index
    %68 = vector.load %arg5[%c2_51, %c0_52, %c0_53] : memref<3x16x32xf32, #tpu.memory_space<vmem>>, vector<1x16x32xf32>
    %69 = vector.shape_cast %68 : vector<1x16x32xf32> to vector<16x32xf32>
    %cst_54 = arith.constant dense<0.000000e+00> : vector<98x32xf32>
    %70 = tpu.matmul %67, %69, %cst_54 {dimension_numbers = #tpu.dot_dimension_numbers<[1], [0], [0], [1], [0, 0, 1, 1], [], []>} : vector<98x16xf32>, vector<16x32xf32>, vector<98x32xf32> -> vector<98x32xf32>
    %71 = arith.addf %66, %70 : vector<98x32xf32>
    %72 = vector.broadcast %39 : vector<1x32xf32> to vector<98x32xf32>
    %73 = arith.addf %71, %72 : vector<98x32xf32>
    %cst_55 = arith.constant 0.000000e+00 : f32
    %74 = vector.broadcast %cst_55 : f32 to vector<98x32xf32>
    %75 = arith.maximumf %73, %74 : vector<98x32xf32>
    %76 = arith.maximumf %57, %75 : vector<98x32xf32>
    %77 = vector.extract_strided_slice %76 {offsets = [0, 0], sizes = [96, 32], strides = [1, 1]} : vector<98x32xf32> to vector<96x32xf32>
    %c0_56 = arith.constant 0 : index
    %c0_57 = arith.constant 0 : index
    %c0_58 = arith.constant 0 : index
    %78 = vector.load %arg7[%c0_56, %c0_57, %c0_58] : memref<3x32x45xf32, #tpu.memory_space<vmem>>, vector<1x32x45xf32>
    %79 = vector.shape_cast %78 : vector<1x32x45xf32> to vector<32x45xf32>
    %cst_59 = arith.constant dense<0.000000e+00> : vector<96x45xf32>
    %80 = tpu.matmul %77, %79, %cst_59 {dimension_numbers = #tpu.dot_dimension_numbers<[1], [0], [0], [1], [0, 0, 1, 1], [], []>} : vector<96x32xf32>, vector<32x45xf32>, vector<96x45xf32> -> vector<96x45xf32>
    %81 = vector.extract_strided_slice %76 {offsets = [1, 0], sizes = [96, 32], strides = [1, 1]} : vector<98x32xf32> to vector<96x32xf32>
    %c1_60 = arith.constant 1 : index
    %c0_61 = arith.constant 0 : index
    %c0_62 = arith.constant 0 : index
    %82 = vector.load %arg7[%c1_60, %c0_61, %c0_62] : memref<3x32x45xf32, #tpu.memory_space<vmem>>, vector<1x32x45xf32>
    %83 = vector.shape_cast %82 : vector<1x32x45xf32> to vector<32x45xf32>
    %cst_63 = arith.constant dense<0.000000e+00> : vector<96x45xf32>
    %84 = tpu.matmul %81, %83, %cst_63 {dimension_numbers = #tpu.dot_dimension_numbers<[1], [0], [0], [1], [0, 0, 1, 1], [], []>} : vector<96x32xf32>, vector<32x45xf32>, vector<96x45xf32> -> vector<96x45xf32>
    %85 = arith.addf %80, %84 : vector<96x45xf32>
    %86 = vector.extract_strided_slice %76 {offsets = [2, 0], sizes = [96, 32], strides = [1, 1]} : vector<98x32xf32> to vector<96x32xf32>
    %c2_64 = arith.constant 2 : index
    %c0_65 = arith.constant 0 : index
    %c0_66 = arith.constant 0 : index
    %87 = vector.load %arg7[%c2_64, %c0_65, %c0_66] : memref<3x32x45xf32, #tpu.memory_space<vmem>>, vector<1x32x45xf32>
    %88 = vector.shape_cast %87 : vector<1x32x45xf32> to vector<32x45xf32>
    %cst_67 = arith.constant dense<0.000000e+00> : vector<96x45xf32>
    %89 = tpu.matmul %86, %88, %cst_67 {dimension_numbers = #tpu.dot_dimension_numbers<[1], [0], [0], [1], [0, 0, 1, 1], [], []>} : vector<96x32xf32>, vector<32x45xf32>, vector<96x45xf32> -> vector<96x45xf32>
    %90 = arith.addf %85, %89 : vector<96x45xf32>
    %c0_68 = arith.constant 0 : index
    %c0_69 = arith.constant 0 : index
    %91 = vector.load %arg8[%c0_68, %c0_69] : memref<1x45xf32, #tpu.memory_space<vmem>>, vector<1x45xf32>
    %92 = vector.broadcast %91 : vector<1x45xf32> to vector<96x45xf32>
    %93 = arith.addf %90, %92 : vector<96x45xf32>
    %cst_70 = arith.constant 0.000000e+00 : f32
    %94 = vector.broadcast %cst_70 : f32 to vector<96x45xf32>
    %95 = arith.maximumf %93, %94 : vector<96x45xf32>
    %96 = vector.extract_strided_slice %95 {offsets = [0, 0], sizes = [94, 45], strides = [1, 1]} : vector<96x45xf32> to vector<94x45xf32>
    %c0_71 = arith.constant 0 : index
    %c0_72 = arith.constant 0 : index
    %c0_73 = arith.constant 0 : index
    %97 = vector.load %arg9[%c0_71, %c0_72, %c0_73] : memref<3x45x64xf32, #tpu.memory_space<vmem>>, vector<1x45x64xf32>
    %98 = vector.shape_cast %97 : vector<1x45x64xf32> to vector<45x64xf32>
    %cst_74 = arith.constant dense<0.000000e+00> : vector<94x64xf32>
    %99 = tpu.matmul %96, %98, %cst_74 {dimension_numbers = #tpu.dot_dimension_numbers<[1], [0], [0], [1], [0, 0, 1, 1], [], []>} : vector<94x45xf32>, vector<45x64xf32>, vector<94x64xf32> -> vector<94x64xf32>
    %100 = vector.extract_strided_slice %95 {offsets = [1, 0], sizes = [94, 45], strides = [1, 1]} : vector<96x45xf32> to vector<94x45xf32>
    %c1_75 = arith.constant 1 : index
    %c0_76 = arith.constant 0 : index
    %c0_77 = arith.constant 0 : index
    %101 = vector.load %arg9[%c1_75, %c0_76, %c0_77] : memref<3x45x64xf32, #tpu.memory_space<vmem>>, vector<1x45x64xf32>
    %102 = vector.shape_cast %101 : vector<1x45x64xf32> to vector<45x64xf32>
    %cst_78 = arith.constant dense<0.000000e+00> : vector<94x64xf32>
    %103 = tpu.matmul %100, %102, %cst_78 {dimension_numbers = #tpu.dot_dimension_numbers<[1], [0], [0], [1], [0, 0, 1, 1], [], []>} : vector<94x45xf32>, vector<45x64xf32>, vector<94x64xf32> -> vector<94x64xf32>
    %104 = arith.addf %99, %103 : vector<94x64xf32>
    %105 = vector.extract_strided_slice %95 {offsets = [2, 0], sizes = [94, 45], strides = [1, 1]} : vector<96x45xf32> to vector<94x45xf32>
    %c2_79 = arith.constant 2 : index
    %c0_80 = arith.constant 0 : index
    %c0_81 = arith.constant 0 : index
    %106 = vector.load %arg9[%c2_79, %c0_80, %c0_81] : memref<3x45x64xf32, #tpu.memory_space<vmem>>, vector<1x45x64xf32>
    %107 = vector.shape_cast %106 : vector<1x45x64xf32> to vector<45x64xf32>
    %cst_82 = arith.constant dense<0.000000e+00> : vector<94x64xf32>
    %108 = tpu.matmul %105, %107, %cst_82 {dimension_numbers = #tpu.dot_dimension_numbers<[1], [0], [0], [1], [0, 0, 1, 1], [], []>} : vector<94x45xf32>, vector<45x64xf32>, vector<94x64xf32> -> vector<94x64xf32>
    %109 = arith.addf %104, %108 : vector<94x64xf32>
    %c0_83 = arith.constant 0 : index
    %c0_84 = arith.constant 0 : index
    %110 = vector.load %arg10[%c0_83, %c0_84] : memref<1x64xf32, #tpu.memory_space<vmem>>, vector<1x64xf32>
    %111 = vector.broadcast %110 : vector<1x64xf32> to vector<94x64xf32>
    %112 = arith.addf %109, %111 : vector<94x64xf32>
    %cst_85 = arith.constant 0.000000e+00 : f32
    %113 = vector.broadcast %cst_85 : f32 to vector<94x64xf32>
    %114 = arith.maximumf %112, %113 : vector<94x64xf32>
    %c0_86 = arith.constant 0 : index
    %c0_87 = arith.constant 0 : index
    %115 = vector.load %arg11[%c0_86, %c0_87] : memref<2x94xf32, #tpu.memory_space<vmem>>, vector<2x94xf32>
    %cst_88 = arith.constant dense<0.000000e+00> : vector<2x64xf32>
    %116 = tpu.matmul %115, %114, %cst_88 {dimension_numbers = #tpu.dot_dimension_numbers<[1], [0], [0], [1], [0, 0, 1, 1], [], []>} : vector<2x94xf32>, vector<94x64xf32>, vector<2x64xf32> -> vector<2x64xf32>
    %c0_89 = arith.constant 0 : index
    %c0_90 = arith.constant 0 : index
    %117 = vector.load %arg12[%c0_89, %c0_90] : memref<1x1xf32, #tpu.memory_space<vmem>>, vector<1x1xf32>
    %118 = vector.broadcast %117 : vector<1x1xf32> to vector<2x64xf32>
    %119 = arith.addf %116, %118 : vector<2x64xf32>
    %c0_91 = arith.constant 0 : index
    %c0_92 = arith.constant 0 : index
    %120 = vector.load %arg13[%c0_91, %c0_92] : memref<2x64xf32, #tpu.memory_space<vmem>>, vector<2x64xf32>
    tpu.vector_store %arg13[%c0_91, %c0_92], %119 {strides = array<i32>} : memref<2x64xf32, #tpu.memory_space<vmem>>, vector<2x64xf32>,
    return
  }
  func.func @transform_0(%arg0: i32) -> (i32, i32) {
    %c0_i32 = arith.constant 0 : i32
    %c0_i32_0 = arith.constant 0 : i32
    return %arg0, %c0_i32 : i32, i32
  }
  func.func @transform_1(%arg0: i32) -> (i32, i32) {
    %c0_i32 = arith.constant 0 : i32
    %c0_i32_0 = arith.constant 0 : i32
    return %arg0, %c0_i32 : i32, i32
  }
  func.func @transform_2(%arg0: i32) -> (i32, i32, i32) {
    %c0_i32 = arith.constant 0 : i32
    %c0_i32_0 = arith.constant 0 : i32
    %c0_i32_1 = arith.constant 0 : i32
    %c0_i32_2 = arith.constant 0 : i32
    return %c0_i32, %c0_i32_0, %c0_i32_1 : i32, i32, i32
  }
  func.func @transform_3(%arg0: i32) -> (i32, i32) {
    %c0_i32 = arith.constant 0 : i32
    %c0_i32_0 = arith.constant 0 : i32
    %c0_i32_1 = arith.constant 0 : i32
    return %c0_i32, %c0_i32_0 : i32, i32
  }
  func.func @transform_4(%arg0: i32) -> (i32, i32, i32) {
    %c0_i32 = arith.constant 0 : i32
    %c0_i32_0 = arith.constant 0 : i32
    %c0_i32_1 = arith.constant 0 : i32
    %c0_i32_2 = arith.constant 0 : i32
    return %c0_i32, %c0_i32_0, %c0_i32_1 : i32, i32, i32
  }
  func.func @transform_5(%arg0: i32) -> (i32, i32) {
    %c0_i32 = arith.constant 0 : i32
    %c0_i32_0 = arith.constant 0 : i32
    %c0_i32_1 = arith.constant 0 : i32
    return %c0_i32, %c0_i32_0 : i32, i32
  }
  func.func @transform_6(%arg0: i32) -> (i32, i32, i32) {
    %c0_i32 = arith.constant 0 : i32
    %c0_i32_0 = arith.constant 0 : i32
    %c0_i32_1 = arith.constant 0 : i32
    %c0_i32_2 = arith.constant 0 : i32
    return %c0_i32, %c0_i32_0, %c0_i32_1 : i32, i32, i32
  }
  func.func @transform_7(%arg0: i32) -> (i32, i32) {
    %c0_i32 = arith.constant 0 : i32
    %c0_i32_0 = arith.constant 0 : i32
    %c0_i32_1 = arith.constant 0 : i32
    return %c0_i32, %c0_i32_0 : i32, i32
  }
  func.func @transform_8(%arg0: i32) -> (i32, i32, i32) {
    %c0_i32 = arith.constant 0 : i32
    %c0_i32_0 = arith.constant 0 : i32
    %c0_i32_1 = arith.constant 0 : i32
    %c0_i32_2 = arith.constant 0 : i32
    return %c0_i32, %c0_i32_0, %c0_i32_1 : i32, i32, i32
  }
  func.func @transform_9(%arg0: i32) -> (i32, i32) {
    %c0_i32 = arith.constant 0 : i32
    %c0_i32_0 = arith.constant 0 : i32
    %c0_i32_1 = arith.constant 0 : i32
    return %c0_i32, %c0_i32_0 : i32, i32
  }
  func.func @transform_10(%arg0: i32) -> (i32, i32) {
    %c0_i32 = arith.constant 0 : i32
    %c0_i32_0 = arith.constant 0 : i32
    %c0_i32_1 = arith.constant 0 : i32
    return %c0_i32, %c0_i32_0 : i32, i32
  }
  func.func @transform_11(%arg0: i32) -> (i32, i32) {
    %c0_i32 = arith.constant 0 : i32
    %c0_i32_0 = arith.constant 0 : i32
    %c0_i32_1 = arith.constant 0 : i32
    return %c0_i32, %c0_i32_0 : i32, i32
  }
  func.func @transform_12(%arg0: i32) -> (i32, i32) {
    %c0_i32 = arith.constant 0 : i32
    %c0_i32_0 = arith.constant 0 : i32
    return %arg0, %c0_i32 : i32, i32
  }
}

</mosaic_0001>

<bundles_post_ra>
// kernel: tpu_custom_call.1
= control target key start
LH: loop header
LB: loop body
LE: loop exit
PB: predicated region body
PF: predicated region fallthrough
CT: control target
= control target key end

     0   :  { %s3355_s0 = inlined_call_operand.vmem [shape: f32[100,3], index: 0, kind: input, shape index: {}]   ;;  %s3356_s1 = inlined_call_operand.vmem [shape: f32[100,3], index: 1, kind: input, shape index: {}]   ;;  %s3357_s2 = inlined_call_operand.vmem [shape: f32[3,3,16], index: 2, kind: input, shape index: {}]   ;;  %s3358_s3 = inlined_call_operand.vmem [shape: f32[1,16], index: 3, kind: input, shape index: {}]   ;;  %s3359_s4 = inlined_call_operand.vmem [shape: f32[3,16,32], index: 4, kind: input, shape index: {}]   ;;  %s3360_s5 = inlined_call_operand.vmem [shape: f32[1,32], index: 5, kind: input, shape index: {}]   ;;  %s3361_s6 = inlined_call_operand.hbm [shape: f32[3,32,45], index: 6, kind: input, shape index: {}]   ;;  %s3362_s7 = inlined_call_operand.vmem [shape: f32[1,45], index: 7, kind: input, shape index: {}]   ;;  %s3363_s8 = inlined_call_operand.vmem [shape: f32[3,45,64], index: 8, kind: input, shape index: {}]   ;;  %s3364_s9 = inlined_call_operand.vmem [shape: f32[1,64], index: 9, kind: input, shape index: {}]   ;;  %s3365_s10 = inlined_call_operand.vmem [shape: f32[2,94], index: 10, kind: input, shape index: {}]   ;;  %s3366_s11 = inlined_call_operand.<no memory space> [shape: f32[1,1], index: 11, kind: input, shape index: {}]   ;;  %s3367_s12 = inlined_call_operand.hbm [shape: f32[2,64], index: 12, kind: output, shape index: {}]  }
   0x1   :  { %v17_v0 = vstv %s3366_s11 }
   0x2   :  { %18 = vst [vmem:[#allocation2] sm:$0x1] %v17_v0 }
   0x3   :  { %19 = vsyncpa [#allocation4], 0 }
   0x4   :  { %20 = vsyncpa [#allocation5], 0  ;;  %s37_s25 = sshll.u32 %s3361_s6, 4  ;;  %s2407_s26 = smov [#allocation3]   ;;  %s38_s25 = int_to_ptr.hbm [resolvable:$true] %s37_s25 }
   0x5   :  { %s39_s27 = sshll.u32 %s2407_s26, 4  ;;  %s2408_s28 = smov 128   ;;  %s40_s27 = int_to_ptr.vmem [resolvable:$true] %s39_s27 }
   0x6   :  { %s2409_s29 = smov 8  }
   0x7   :  { %45 = dma.hbm_to_vmem [thread:$0]  %s38_s25, 1536, %s40_s27, [#allocation4], %s2408_s28, %s2408_s28, %s2409_s29  }
   0x8   :  { %2403 = dma.done.wait [#allocation4], 1536  }
   0x9   :  { %2404 = vsyncadd [#allocation4], 4294965760  ;;  %vm130_vm0 = vcmask 1042432   ;;  %vm90_vm1 = vcmask 23552   ;;  %v2085_v1 = vld [vmem:[%s3357_s2 + $0x4] sm:$0x7] }
   0xa   :  { %v87_v2 = vld [vmem:[%s3357_s2] sm:$0x7]  ;;  %2086 = vmatpush.msk.msra.mxu0 %vm130_vm0, %v2085_v1  ;;  %2342 = vmatpush.msk.msra.mxu3 %vm130_vm0, %v2085_v1  ;;  %v2522_v7 = vld [vmem:[%s3356_s1 + $0x8] sm:$0xff]  ;;  %v2553_v12 = vld [vmem:[%s3356_s1 + $0x10] sm:$0xff]  ;;  %vm290_vm2 = vcmask 1046528   ;;  %vm707_vm3 = vcmask 130048  }
   0xb   :  { %v2492_v3 = vld [vmem:[%s3356_s1] sm:$0xff]  ;;  %2100 = vmatpush.msk.msra.mxu1 %vm130_vm0, %v87_v2  ;;  %2343 = vmatpush.msk.msra.mxu2 %vm130_vm0, %v87_v2  ;;  %v61_v8 = vld [vmem:[%s3355_s0 + $0x8] sm:$0xff]  ;;  %v62_v13 = vld [vmem:[%s3355_s0 + $0x10] sm:$0xff]  ;;  %v556_v38 = vrot.slane %v2522_v7, 1  ;;  %v558_v45 = vrot.slane %v2553_v12, 1  ;;  %vm1368_vm4 = vcmask 261120  }
   0xc   :  { %v60_v4 = vld [vmem:[%s3355_s0] sm:$0xff]  ;;  %2087 = vmatmul.msk.f32.vlgmr.msra.gmra.mxu0 %vm90_vm1, %v2492_v3  ;;  %2129 = vmatpush.msk.msrb.mxu3 %vm130_vm0, %v2085_v1  ;;  %v2531_v9 = vld [vmem:[%s3355_s0 + $0x48] sm:$0xff]  ;;  %v2561_v14 = vld [vmem:[%s3355_s0 + $0x50] sm:$0xff]  ;;  %v292_v25 = vrot.slane %v61_v8, 1  ;;  %v294_v29 = vrot.slane %v62_v13, 1  ;;  %v555_v37 = vrot.slane %v2492_v3, 1 }
   0xd   :  { %v2502_v5 = vld [vmem:[%s3355_s0 + $0x40] sm:$0xff]  ;;  %2101 = vmatmul.msk.f32.vlgmr.msra.gmra.mxu1 %vm90_vm1, %v60_v4  ;;  %2143 = vmatpush.msk.msrb.mxu0 %vm130_vm0, %v87_v2  ;;  %v2114_v10 = vld [vmem:[%s3357_s2 + $0x8] sm:$0x7]  ;;  %v2568_v15 = vld [vmem:[%s3356_s1 + $0x50] sm:$0xff]  ;;  %v291_v24 = vrot.slane %v60_v4, 1  ;;  %v308_v40 = vrot.slane %v2531_v9, 1  ;;  %v559_v49 = vsel %vm290_vm2, %v556_v38, %v558_v45 }
   0xe   :  { %2109 = vmatmul.msk.f32.vlgmr.msra.gmra.mxu2 %vm90_vm1, %v2502_v5  ;;  %v2513_v6 = vld [vmem:[%s3356_s1 + $0x40] sm:$0xff]  ;;  %2157 = vmatpush.msk.msrb.mxu1 %vm130_vm0, %v2114_v10  ;;  %v2543_v11 = vld [vmem:[%s3356_s1 + $0x48] sm:$0xff]  ;;  %v2578_v16 = vld [vmem:[%s3356_s1 + $0x18] sm:$0xff]  ;;  %v295_v32 = vsel %vm290_vm2, %v292_v25, %v294_v29  ;;  %v557_v42 = vsel %vm290_vm2, %v555_v37, %v556_v38  ;;  %v306_v43 = vrot.slane %v2502_v5, 1  ;;  %v310_v47 = vrot.slane %v2561_v14, 1  ;;  %s2411_s27 = smov [#allocation6]  }
   0xf   :  { %2095 = vmatmul.msk.f32.vlgmr.msra.gmra.mxu3 %vm90_vm1, %v2513_v6  ;;  %2115 = vmatpush.msk.msrb.mxu2 %vm130_vm0, %v2114_v10  ;;  %v63_v17 = vld [vmem:[%s3355_s0 + $0x18] sm:$0xff]  ;;  %v2603_v20 = vld [vmem:[%s3356_s1 + $0x20] sm:$0xff]  ;;  %v2628_v26 = vld [vmem:[%s3356_s1 + $0x28] sm:$0xff]  ;;  %v293_v28 = vsel %vm290_vm2, %v291_v24, %v292_v25  ;;  %v560_v51 = vrot.slane %v2578_v16, 1  ;;  %vm1528_vm5 = vcmask 1045504   ;;  %vm1744_vm6 = vcmask 1044480  }
  0x10   :  { %v2586_v18 = vld [vmem:[%s3355_s0 + $0x58] sm:$0xff]  ;;  %v64_v21 = vld [vmem:[%s3355_s0 + $0x20] sm:$0xff]  ;;  %v65_v27 = vld [vmem:[%s3355_s0 + $0x28] sm:$0xff]  ;;  %v296_v33 = vrot.slane %v63_v17, 1  ;;  %v309_v44 = vsel %vm290_vm2, %v306_v43, %v308_v40  ;;  %v311_v50 = vsel %vm290_vm2, %v308_v40, %v310_v47  ;;  %v562_v57 = vrot.slane %v2603_v20, 1  ;;  %s2073_s28 = sshll.u32 %s2411_s27, 4  ;;  %s2074_s28 = int_to_ptr.vmem [resolvable:$true] %s2073_s28 }
  0x11   :  { %v2593_v19 = vld [vmem:[%s3356_s1 + $0x58] sm:$0xff]  ;;  %v2611_v22 = vld [vmem:[%s3355_s0 + $0x60] sm:$0xf]  ;;  %v2642_v30 = vld [vmem:[%s3356_s1 + $0x30] sm:$0xff]  ;;  %v298_v39 = vrot.slane %v64_v21, 1  ;;  %v300_v46 = vrot.slane %v65_v27, 1  ;;  %v561_v55 = vsel %vm290_vm2, %v558_v45, %v560_v51 }
  0x12   :  { %v2618_v23 = vld [vmem:[%s3356_s1 + $0x60] sm:$0xf]  ;;  %v66_v31 = vld [vmem:[%s3355_s0 + $0x30] sm:$0xff]  ;;  %v2656_v34 = vld [vmem:[%s3356_s1 + $0x38] sm:$0xff]  ;;  %v297_v36 = vsel %vm290_vm2, %v294_v29, %v296_v33  ;;  %v312_v53 = vrot.slane %v2586_v18, 1  ;;  %v563_v60 = vsel %vm290_vm2, %v560_v51, %v562_v57  ;;  %v564_v61 = vrot.slane %v2628_v26, 1 }
  0x13   :  { %v67_v35 = vld [vmem:[%s3355_s0 + $0x38] sm:$0xff]  ;;  %v299_v41 = vsel %vm290_vm2, %v296_v33, %v298_v39  ;;  %v301_v48 = vsel %vm290_vm2, %v298_v39, %v300_v46  ;;  %v302_v52 = vrot.slane %v66_v31, 1  ;;  %v314_v62 = vrot.slane %v2611_v22, 1  ;;  %v2199_v37 = vld [vmem:[%s3359_s4 + $0x20] sm:$0xff]  ;;  %v2171_v38 = vld [vmem:[%s3359_s4 + $0x10] sm:$0xff]  ;;  %s2075_s11 = sshll.u32 %s3367_s12, 4  ;;  %s2076_s11 = int_to_ptr.hbm [resolvable:$true] %s2075_s11 }
  0x14   :  { %2088 = vmatmul.msk.f32.gmra.mxu0 %vm90_vm1, %v2522_v7  ;;  %v313_v56 = vsel %vm290_vm2, %v310_v47, %v312_v53  ;;  %v304_v58 = vrot.slane %v67_v35, 1  ;;  %v565_v0 = vsel %vm290_vm2, %v562_v57, %v564_v61  ;;  %v566_v2 = vrot.slane %v2642_v30, 1 }
  0x15   :  { %2102 = vmatmul.msk.f32.gmra.mxu1 %vm90_vm1, %v61_v8  ;;  %v303_v54 = vsel %vm290_vm2, %v300_v46, %v302_v52  ;;  %v315_v1 = vsel %vm290_vm2, %v312_v53, %v314_v62  ;;  %v568_v4 = vrot.slane %v2656_v34, 1  ;;  %v576_v24 = vrot.slane %v2593_v19, 1  ;;  %v2816_v46 = vld [vmem:[%s3358_s3] ss:$0 sm:$0xff] }
  0x16   :  { %2110 = vmatmul.msk.f32.gmra.mxu2 %vm90_vm1, %v2531_v9  ;;  %v305_v59 = vsel %vm290_vm2, %v302_v52, %v304_v58  ;;  %v307_v63 = vsel %vm290_vm2, %v304_v58, %v306_v43  ;;  %v572_v9 = vrot.slane %v2543_v11, 1  ;;  %vm1719_vm7 = vcmask 367616  }
  0x17   :  { %2096 = vmatmul.msk.f32.gmra.mxu3 %vm90_vm1, %v2543_v11  ;;  %v569_v5 = vsel %vm290_vm2, %v566_v2, %v568_v4  ;;  %vm2039_vm8 = vcmask 769024   ;;  %vm2066_vm9 = vcmask 517120  }
  0x1c   :  { %2089 = vmatmul.msk.f32.gmra.mxu0 %vm90_vm1, %v2553_v12 }
  0x1d   :  { %2103 = vmatmul.msk.f32.gmra.mxu1 %vm90_vm1, %v62_v13 }
  0x1e   :  { %2111 = vmatmul.msk.f32.gmra.mxu2 %vm90_vm1, %v2561_v14  ;;  %v574_v14 = vrot.slane %v2568_v15, 1 }
  0x1f   :  { %2097 = vmatmul.msk.f32.gmra.mxu3 %vm90_vm1, %v2568_v15 }
  0x24   :  { %2090 = vmatmul.msk.f32.gmra.mxu0 %vm90_vm1, %v2578_v16 }
  0x25   :  { %2104 = vmatmul.msk.f32.gmra.mxu1 %vm90_vm1, %v63_v17 }
  0x26   :  { %2112 = vmatmul.msk.f32.gmra.mxu2 %vm90_vm1, %v2586_v18 }
  0x27   :  { %2098 = vmatmul.msk.f32.gmra.mxu3 %vm90_vm1, %v2593_v19 }
  0x2c   :  { %2091 = vmatmul.msk.f32.gmra.mxu0 %vm90_vm1, %v2603_v20 }
  0x2d   :  { %2105 = vmatmul.msk.f32.gmra.mxu1 %vm90_vm1, %v64_v21 }
  0x2e   :  { %2113 = vmatmul.msk.f32.gmra.mxu2 %vm90_vm1, %v2611_v22  ;;  %v703_v22 = vld [vmem:[%s3359_s4 + $0x8] sm:$0xff] }
  0x2f   :  { %2099 = vmatmul.msk.f32.gmra.mxu3 %vm90_vm1, %v2618_v23 }
  0x30   :  { %856 = vmatpush.msra.mxu3 %v703_v22 }
  0x34   :  { %2092 = vmatmul.msk.f32.gmra.mxu0 %vm90_vm1, %v2628_v26 }
  0x35   :  { %2106 = vmatmul.msk.f32.gmra.mxu1 %vm90_vm1, %v65_v27 }
  0x36   :  { %2116 = vmatmul.msk.f32.vlgmr.msrb.gmra.mxu2 %vm90_vm1, %v293_v28 }
  0x37   :  { %2130 = vmatmul.msk.f32.vlgmr.msrb.gmra.mxu3 %vm90_vm1, %v293_v28  ;;  %v577_v28 = vsel %vm290_vm2, %v574_v14, %v576_v24 }
  0x3c   :  { %2093 = vmatmul.msk.f32.gmra.mxu0 %vm90_vm1, %v2642_v30 }
  0x3d   :  { %2107 = vmatmul.msk.f32.gmra.mxu1 %vm90_vm1, %v66_v31 }
  0x3e   :  { %2117 = vmatmul.msk.f32.gmra.mxu2 %vm90_vm1, %v295_v32 }
  0x3f   :  { %2131 = vmatmul.msk.f32.gmra.mxu3 %vm90_vm1, %v295_v32 }
  0x44   :  { %2094 = vmatmul.msk.f32.gmra.mxu0 %vm90_vm1, %v2656_v34 }
  0x45   :  { %2108 = vmatmul.msk.f32.gmra.mxu1 %vm90_vm1, %v67_v35 }
  0x46   :  { %2118 = vmatmul.msk.f32.gmra.mxu2 %vm90_vm1, %v297_v36 }
  0x47   :  { %2132 = vmatmul.msk.f32.gmra.mxu3 %vm90_vm1, %v297_v36 }
  0x4c   :  { %2144 = vmatmul.msk.f32.vlgmr.msrb.gmra.mxu0 %vm90_vm1, %v2492_v3  ;;  %v567_v3 = vsel %vm290_vm2, %v564_v61, %v566_v2 }
  0x4d   :  { %2158 = vmatmul.msk.f32.vlgmr.msrb.gmra.mxu1 %vm90_vm1, %v557_v42 }
  0x4e   :  { %2119 = vmatmul.msk.f32.gmra.mxu2 %vm90_vm1, %v299_v41 }
  0x4f   :  { %2133 = vmatmul.msk.f32.gmra.mxu3 %vm90_vm1, %v299_v41 }
  0x54   :  { %2145 = vmatmul.msk.f32.gmra.mxu0 %vm90_vm1, %v2522_v7  ;;  %v570_v7 = vrot.slane %v2513_v6, 1 }
  0x55   :  { %2159 = vmatmul.msk.f32.gmra.mxu1 %vm90_vm1, %v559_v49 }
  0x56   :  { %2120 = vmatmul.msk.f32.gmra.mxu2 %vm90_vm1, %v301_v48  ;;  %v571_v8 = vsel %vm290_vm2, %v568_v4, %v570_v7  ;;  %v573_v13 = vsel %vm290_vm2, %v570_v7, %v572_v9 }
  0x57   :  { %2134 = vmatmul.msk.f32.gmra.mxu3 %vm90_vm1, %v301_v48 }
  0x5c   :  { %2146 = vmatmul.msk.f32.gmra.mxu0 %vm90_vm1, %v2553_v12 }
  0x5d   :  { %2160 = vmatmul.msk.f32.gmra.mxu1 %vm90_vm1, %v561_v55 }
  0x5e   :  { %2121 = vmatmul.msk.f32.gmra.mxu2 %vm90_vm1, %v303_v54 }
  0x5f   :  { %2135 = vmatmul.msk.f32.gmra.mxu3 %vm90_vm1, %v303_v54 }
  0x64   :  { %2147 = vmatmul.msk.f32.gmra.mxu0 %vm90_vm1, %v2578_v16 }
  0x65   :  { %2161 = vmatmul.msk.f32.gmra.mxu1 %vm90_vm1, %v563_v60 }
  0x66   :  { %2122 = vmatmul.msk.f32.gmra.mxu2 %vm90_vm1, %v305_v59 }
  0x67   :  { %2136 = vmatmul.msk.f32.gmra.mxu3 %vm90_vm1, %v305_v59 }
  0x6c   :  { %2148 = vmatmul.msk.f32.gmra.mxu0 %vm90_vm1, %v2603_v20  ;;  %v575_v20 = vsel %vm290_vm2, %v572_v9, %v574_v14 }
  0x6d   :  { %2162 = vmatmul.msk.f32.gmra.mxu1 %vm90_vm1, %v565_v0 }
  0x6e   :  { %2123 = vmatmul.msk.f32.gmra.mxu2 %vm90_vm1, %v307_v63 }
  0x6f   :  { %2137 = vmatmul.msk.f32.gmra.mxu3 %vm90_vm1, %v307_v63 }
  0x74   :  { %2149 = vmatmul.msk.f32.gmra.mxu0 %vm90_vm1, %v2628_v26 }
  0x75   :  { %2163 = vmatmul.msk.f32.gmra.mxu1 %vm90_vm1, %v567_v3 }
  0x76   :  { %2124 = vmatmul.msk.f32.gmra.mxu2 %vm90_vm1, %v309_v44 }
  0x77   :  { %2138 = vmatmul.msk.f32.gmra.mxu3 %vm90_vm1, %v309_v44 }
  0x7c   :  { %2150 = vmatmul.msk.f32.gmra.mxu0 %vm90_vm1, %v2642_v30  ;;  %v578_v30 = vrot.slane %v2618_v23, 1 }
  0x7d   :  { %2164 = vmatmul.msk.f32.gmra.mxu1 %vm90_vm1, %v569_v5 }
  0x7e   :  { %2125 = vmatmul.msk.f32.gmra.mxu2 %vm90_vm1, %v311_v50 }
  0x7f   :  { %2139 = vmatmul.msk.f32.gmra.mxu3 %vm90_vm1, %v311_v50 }
  0x84   :  { %2151 = vmatmul.msk.f32.gmra.mxu0 %vm90_vm1, %v2656_v34  ;;  %v579_v34 = vsel %vm290_vm2, %v576_v24, %v578_v30 }
  0x85   :  { %2165 = vmatmul.msk.f32.gmra.mxu1 %vm90_vm1, %v571_v8 }
  0x86   :  { %2126 = vmatmul.msk.f32.gmra.mxu2 %vm90_vm1, %v313_v56 }
  0x87   :  { %2140 = vmatmul.msk.f32.gmra.mxu3 %vm90_vm1, %v313_v56 }
  0x89   :  { %v151_v10 = vpop.f32.mrf.mxu0 }
  0x8a   :  { %v249_v12 = vpop.f32.mrf.mxu1 }
  0x8b   :  { %v250_v45 = vadd.f32 %v249_v12, %v151_v10 }
  0x8c   :  { %2152 = vmatmul.msk.f32.gmra.mxu0 %vm90_vm1, %v2513_v6  ;;  %v2172_v6 = vld [vmem:[%s3359_s4 + $0x18] sm:$0xff] }
  0x8d   :  { %2166 = vmatmul.msk.f32.gmra.mxu1 %vm90_vm1, %v573_v13  ;;  %761 = vmatpush.msra.mxu2 %v2172_v6 }
  0x8e   :  { %2127 = vmatmul.msk.f32.gmra.mxu2 %vm90_vm1, %v315_v1  ;;  %1064 = vmatpush.msra.mxu1 %v2172_v6 }
  0x8f   :  { %2141 = vmatmul.msk.f32.gmra.mxu3 %vm90_vm1, %v315_v1  ;;  %762 = vmatpush.msra.mxu2 %v2171_v38 }
  0x90   :  { %1065 = vmatpush.msra.mxu1 %v2171_v38 }
  0x91   :  { %v2746_v16 = vpop.f32.mrf.mxu2  ;;  %v154_v17 = vpop.f32.mrf.mxu0  ;;  %1120 = vmatpush.msrb.mxu2 %v703_v22 }
  0x92   :  { %v252_v18 = vpop.f32.mrf.mxu1  ;;  %v2749_v21 = vpop.f32.mrf.mxu3 }
  0x93   :  { %v253_v53 = vadd.f32 %v252_v18, %v154_v17 }
  0x94   :  { %2153 = vmatmul.msk.f32.gmra.mxu0 %vm90_vm1, %v2543_v11  ;;  %v702_v11 = vld [vmem:[%s3359_s4] sm:$0xff] }
  0x95   :  { %2167 = vmatmul.msk.f32.gmra.mxu1 %vm90_vm1, %v575_v20  ;;  %857 = vmatpush.msra.mxu3 %v702_v11 }
  0x96   :  { %2128 = vmatmul.msk.f32.gmra.mxu2 %vm90_vm1, %v314_v62 }
  0x97   :  { %2142 = vmatmul.msk.f32.gmra.mxu3 %vm90_vm1, %v314_v62  ;;  %1121 = vmatpush.msrb.mxu2 %v702_v11 }
  0x99   :  { %v2763_v25 = vpop.f32.mrf.mxu2  ;;  %v157_v26 = vpop.f32.mrf.mxu0 }
  0x9a   :  { %v255_v27 = vpop.f32.mrf.mxu1  ;;  %v2766_v29 = vpop.f32.mrf.mxu3 }
  0x9b   :  { %v256_v61 = vadd.f32 %v255_v27, %v157_v26 }
  0x9c   :  { %2154 = vmatmul.msk.f32.gmra.mxu0 %vm90_vm1, %v2568_v15  ;;  %v2200_v15 = vld [vmem:[%s3359_s4 + $0x28] sm:$0xff] }
  0x9d   :  { %2168 = vmatmul.msk.f32.gmra.mxu1 %vm90_vm1, %v577_v28  ;;  %966 = vmatpush.msra.mxu0 %v2200_v15 }
  0x9e   :  { %1227 = vmatpush.msrb.mxu3 %v2200_v15 }
  0x9f   :  { %967 = vmatpush.msra.mxu0 %v2199_v37 }
  0xa0   :  { %1228 = vmatpush.msrb.mxu3 %v2199_v37 }
  0xa1   :  { %v2775_v31 = vpop.f32.mrf.mxu2  ;;  %v2777_v32 = vpop.f32.mrf.mxu0 }
  0xa2   :  { %v258_v33 = vpop.f32.mrf.mxu1  ;;  %v2780_v35 = vpop.f32.mrf.mxu3 }
  0xa3   :  { %v259_v13 = vadd.f32 %v258_v33, %v2777_v32 }
  0xa4   :  { %2155 = vmatmul.msk.f32.gmra.mxu0 %vm90_vm1, %v2593_v19 }
  0xa5   :  { %2169 = vmatmul.msk.f32.gmra.mxu1 %vm90_vm1, %v579_v34 }
  0xa9   :  { %v2788_v36 = vpop.f32.mrf.mxu2  ;;  %v2796_v39 = vpop.f32.mrf.mxu0 }
  0xaa   :  { %v2798_v19 = vpop.f32.mrf.mxu1  ;;  %v2800_v40 = vpop.f32.mrf.mxu3 }
  0xab   :  { %v262_v33 = vadd.f32 %v2798_v19, %v2796_v39 }
  0xac   :  { %2156 = vmatmul.msk.f32.gmra.mxu0 %vm90_vm1, %v2618_v23 }
  0xad   :  { %2170 = vmatmul.msk.f32.gmra.mxu1 %vm90_vm1, %v578_v30 }
  0xb1   :  { %v2805_v41 = vpop.f32.mrf.mxu2  ;;  %v2807_v42 = vpop.f32.mrf.mxu0 }
  0xb2   :  { %v2809_v43 = vpop.f32.mrf.mxu1  ;;  %v2811_v44 = vpop.f32.mrf.mxu3 }
  0xb9   :  { %v362_v47 = vpop.f32.mrf.mxu2  ;;  %v2818_v23 = vpop.f32.mrf.mxu0 }
  0xba   :  { %v401_v48 = vadd.f32 %v362_v47, %v250_v45  ;;  %v2820_v49 = vpop.f32.mrf.mxu1  ;;  %v460_v50 = vpop.f32.mrf.mxu3 }
  0xbc   :  { %v417_v51 = vadd.f32 %v2816_v46, %v401_v48 }
  0xbe   :  { %v430_v52 = vmax.f32 %v417_v51, 0.0 }
  0xc0   :  { %2186 = vmatmul.msk.f32.vlgmr.msra.gmra.mxu3 %vm707_vm3, %v430_v52  ;;  %v901_v62 = vrot.slane %v430_v52, 1 }
  0xc1   :  { %v365_v54 = vpop.f32.mrf.mxu2  ;;  %v2824_v56 = vpop.f32.mrf.mxu0 }
  0xc2   :  { %v402_v55 = vadd.f32 %v365_v54, %v253_v53  ;;  %v2826_v57 = vpop.f32.mrf.mxu1  ;;  %v463_v58 = vpop.f32.mrf.mxu3  ;;  %v265_v54 = vadd.f32 %v2809_v43, %v2807_v42 }
  0xc4   :  { %v418_v59 = vadd.f32 %v2816_v46, %v402_v55 }
  0xc6   :  { %v431_v60 = vmax.f32 %v418_v59, 0.0 }
  0xc8   :  { %2187 = vmatmul.msk.f32.gmra.mxu3 %vm707_vm3, %v431_v60  ;;  %v902_v63 = vrot.slane %v431_v60, 1 }
  0xc9   :  { %v368_v0 = vpop.f32.mrf.mxu2  ;;  %v516_v2 = vpop.f32.mrf.mxu0 }
  0xca   :  { %v403_v1 = vadd.f32 %v368_v0, %v256_v61  ;;  %v903_v3 = vsel %vm290_vm2, %v901_v62, %v902_v63  ;;  %v517_v4 = vadd.f32 %v516_v2, %v460_v50  ;;  %v623_v5 = vpop.f32.mrf.mxu1  ;;  %v466_v7 = vpop.f32.mrf.mxu3 }
  0xcb   :  { %2201 = vmatmul.msk.f32.vlgmr.msra.gmra.mxu0 %vm707_vm3, %v903_v3  ;;  %2214 = vmatmul.msk.f32.vlgmr.msra.gmra.mxu1 %vm707_vm3, %v903_v3 }
  0xcc   :  { %v419_v8 = vadd.f32 %v2816_v46, %v403_v1  ;;  %v662_v9 = vadd.f32 %v623_v5, %v517_v4  ;;  %v268_v4 = vadd.f32 %v2820_v49, %v2818_v23 }
  0xce   :  { %v432_v10 = vmax.f32 %v419_v8, 0.0  ;;  %v675_v12 = vadd.f32 %v2816_v46, %v662_v9 }
  0xd0   :  { %2188 = vmatmul.msk.f32.gmra.mxu3 %vm707_vm3, %v432_v10  ;;  %v904_v14 = vrot.slane %v432_v10, 1  ;;  %v2837_v17 = vmax.f32 %v675_v12, 0.0 }
  0xd1   :  { %v371_v18 = vpop.f32.mrf.mxu2  ;;  %v519_v6 = vpop.f32.mrf.mxu0 }
  0xd2   :  { %v404_v20 = vadd.f32 %v371_v18, %v259_v13  ;;  %v905_v22 = vsel %vm290_vm2, %v902_v63, %v904_v14  ;;  %v520_v24 = vadd.f32 %v519_v6, %v463_v58  ;;  %v626_v26 = vpop.f32.mrf.mxu1  ;;  %v469_v27 = vpop.f32.mrf.mxu3  ;;  %2173 = vmatmul.msk.f32.vlgmr.msra.gmra.mxu2 %vm707_vm3, %v2837_v17 }
  0xd3   :  { %2202 = vmatmul.msk.f32.gmra.mxu0 %vm707_vm3, %v905_v22  ;;  %2215 = vmatmul.msk.f32.gmra.mxu1 %vm707_vm3, %v905_v22  ;;  %v271_v22 = vadd.f32 %v2826_v57, %v2824_v56 }
  0xd4   :  { %v420_v28 = vadd.f32 %v2816_v46, %v404_v20  ;;  %v663_v11 = vadd.f32 %v626_v26, %v520_v24 }
  0xd6   :  { %v433_v30 = vmax.f32 %v420_v28, 0.0  ;;  %v676_v32 = vadd.f32 %v2816_v46, %v663_v11 }
  0xd8   :  { %2189 = vmatmul.msk.f32.gmra.mxu3 %vm707_vm3, %v433_v30  ;;  %v906_v34 = vrot.slane %v433_v30, 1  ;;  %v2849_v37 = vmax.f32 %v676_v32, 0.0 }
  0xd9   :  { %v374_v15 = vpop.f32.mrf.mxu2  ;;  %v522_v45 = vpop.f32.mrf.mxu0 }
  0xda   :  { %v405_v38 = vadd.f32 %v374_v15, %v262_v33  ;;  %v907_v47 = vsel %vm290_vm2, %v904_v14, %v906_v34  ;;  %v523_v48 = vadd.f32 %v522_v45, %v466_v7  ;;  %v629_v50 = vpop.f32.mrf.mxu1  ;;  %v472_v51 = vpop.f32.mrf.mxu3  ;;  %2174 = vmatmul.msk.f32.gmra.mxu2 %vm707_vm3, %v2849_v37  ;;  %v274_v45 = vadd.f32 %v2746_v16, %v2749_v21 }
  0xdb   :  { %2203 = vmatmul.msk.f32.gmra.mxu0 %vm707_vm3, %v907_v47  ;;  %2216 = vmatmul.msk.f32.gmra.mxu1 %vm707_vm3, %v907_v47 }
  0xdc   :  { %v421_v52 = vadd.f32 %v2816_v46, %v405_v38  ;;  %v664_v39 = vadd.f32 %v629_v50, %v523_v48 }
  0xde   :  { %v434_v19 = vmax.f32 %v421_v52, 0.0  ;;  %v677_v53 = vadd.f32 %v2816_v46, %v664_v39 }
  0xe0   :  { %2190 = vmatmul.msk.f32.gmra.mxu3 %vm707_vm3, %v434_v19  ;;  %v908_v55 = vrot.slane %v434_v19, 1  ;;  %v2861_v59 = vmax.f32 %v677_v53, 0.0 }
  0xe1   :  { %v377_v58 = vpop.f32.mrf.mxu2  ;;  %v525_v61 = vpop.f32.mrf.mxu0 }
  0xe2   :  { %v406_v60 = vadd.f32 %v377_v58, %v265_v54  ;;  %v909_v62 = vsel %vm290_vm2, %v906_v34, %v908_v55  ;;  %v526_v63 = vadd.f32 %v525_v61, %v469_v27  ;;  %v632_v0 = vpop.f32.mrf.mxu1  ;;  %v475_v1 = vpop.f32.mrf.mxu3  ;;  %2175 = vmatmul.msk.f32.gmra.mxu2 %vm707_vm3, %v2861_v59  ;;  %v277_v58 = vadd.f32 %v2763_v25, %v2766_v29 }
  0xe3   :  { %2204 = vmatmul.msk.f32.gmra.mxu0 %vm707_vm3, %v909_v62  ;;  %2217 = vmatmul.msk.f32.gmra.mxu1 %vm707_vm3, %v909_v62 }
  0xe4   :  { %v422_v2 = vadd.f32 %v2816_v46, %v406_v60  ;;  %v665_v42 = vadd.f32 %v632_v0, %v526_v63 }
  0xe6   :  { %v435_v43 = vmax.f32 %v422_v2, 0.0  ;;  %v678_v3 = vadd.f32 %v2816_v46, %v665_v42 }
  0xe8   :  { %2191 = vmatmul.msk.f32.gmra.mxu3 %vm707_vm3, %v435_v43  ;;  %v910_v5 = vrot.slane %v435_v43, 1  ;;  %v2873_v8 = vmax.f32 %v678_v3, 0.0 }
  0xe9   :  { %v380_v7 = vpop.f32.mrf.mxu2  ;;  %v528_v10 = vpop.f32.mrf.mxu0 }
  0xea   :  { %v407_v9 = vadd.f32 %v380_v7, %v268_v4  ;;  %v911_v12 = vsel %vm290_vm2, %v908_v55, %v910_v5  ;;  %v529_v13 = vadd.f32 %v528_v10, %v472_v51  ;;  %v635_v14 = vpop.f32.mrf.mxu1  ;;  %2176 = vmatmul.msk.f32.gmra.mxu2 %vm707_vm3, %v2873_v8  ;;  %v478_v23 = vpop.f32.mrf.mxu3 }
  0xeb   :  { %2205 = vmatmul.msk.f32.gmra.mxu0 %vm707_vm3, %v911_v12  ;;  %2218 = vmatmul.msk.f32.gmra.mxu1 %vm707_vm3, %v911_v12 }
  0xec   :  { %v423_v18 = vadd.f32 %v2816_v46, %v407_v9  ;;  %v666_v49 = vadd.f32 %v635_v14, %v529_v13 }
  0xee   :  { %v436_v20 = vmax.f32 %v423_v18, 0.0  ;;  %v679_v6 = vadd.f32 %v2816_v46, %v666_v49 }
  0xf0   :  { %v912_v24 = vrot.slane %v436_v20, 1  ;;  %2192 = vmatmul.msk.f32.gmra.mxu3 %vm707_vm3, %v436_v20  ;;  %v2885_v27 = vmax.f32 %v679_v6, 0.0 }
  0xf1   :  { %v383_v26 = vpop.f32.mrf.mxu2  ;;  %v531_v11 = vpop.f32.mrf.mxu0 }
  0xf2   :  { %v408_v28 = vadd.f32 %v383_v26, %v271_v22  ;;  %v913_v30 = vsel %vm290_vm2, %v910_v5, %v912_v24  ;;  %v532_v32 = vadd.f32 %v531_v11, %v475_v1  ;;  %v638_v33 = vpop.f32.mrf.mxu1  ;;  %2177 = vmatmul.msk.f32.gmra.mxu2 %vm707_vm3, %v2885_v27  ;;  %v481_v15 = vpop.f32.mrf.mxu3  ;;  %v280_v5 = vadd.f32 %v2775_v31, %v2780_v35 }
  0xf3   :  { %2206 = vmatmul.msk.f32.gmra.mxu0 %vm707_vm3, %v913_v30  ;;  %2219 = vmatmul.msk.f32.gmra.mxu1 %vm707_vm3, %v913_v30  ;;  %v283_v22 = vadd.f32 %v2788_v36, %v2800_v40 }
  0xf4   :  { %v424_v34 = vadd.f32 %v2816_v46, %v408_v28  ;;  %v667_v56 = vadd.f32 %v638_v33, %v532_v32 }
  0xf6   :  { %v437_v57 = vmax.f32 %v424_v34, 0.0  ;;  %v680_v38 = vadd.f32 %v2816_v46, %v667_v56 }
  0xf8   :  { %v914_v47 = vrot.slane %v437_v57, 1  ;;  %2193 = vmatmul.msk.f32.gmra.mxu3 %vm707_vm3, %v437_v57  ;;  %v2897_v50 = vmax.f32 %v680_v38, 0.0  ;;  %v286_v38 = vadd.f32 %v2805_v41, %v2811_v44 }
  0xf9   :  { %v386_v48 = vpop.f32.mrf.mxu2  ;;  %v534_v52 = vpop.f32.mrf.mxu0 }
  0xfa   :  { %v409_v51 = vadd.f32 %v386_v48, %v274_v45  ;;  %v915_v39 = vsel %vm290_vm2, %v912_v24, %v914_v47  ;;  %v535_v19 = vadd.f32 %v534_v52, %v478_v23  ;;  %v641_v53 = vpop.f32.mrf.mxu1  ;;  %2178 = vmatmul.msk.f32.gmra.mxu2 %vm707_vm3, %v2897_v50  ;;  %v484_v61 = vpop.f32.mrf.mxu3 }
  0xfb   :  { %2207 = vmatmul.msk.f32.gmra.mxu0 %vm707_vm3, %v915_v39  ;;  %2220 = vmatmul.msk.f32.gmra.mxu1 %vm707_vm3, %v915_v39 }
  0xfc   :  { %v425_v54 = vadd.f32 %v2816_v46, %v409_v51  ;;  %v668_v16 = vadd.f32 %v641_v53, %v535_v19 }
  0xfe   :  { %v438_v21 = vmax.f32 %v425_v54, 0.0  ;;  %v681_v55 = vadd.f32 %v2816_v46, %v668_v16 }
 0x100   :  { %v916_v60 = vrot.slane %v438_v21, 1  ;;  %2194 = vmatmul.msk.f32.gmra.mxu3 %vm707_vm3, %v438_v21  ;;  %v2909_v62 = vmax.f32 %v681_v55, 0.0 }
 0x101   :  { %v389_v63 = vpop.f32.mrf.mxu2  ;;  %v537_v1 = vpop.f32.mrf.mxu0 }
 0x102   :  { %v410_v0 = vadd.f32 %v389_v63, %v277_v58  ;;  %v917_v2 = vsel %vm290_vm2, %v914_v47, %v916_v60  ;;  %v538_v42 = vadd.f32 %v537_v1, %v481_v15  ;;  %v644_v43 = vpop.f32.mrf.mxu1  ;;  %2179 = vmatmul.msk.f32.gmra.mxu2 %vm707_vm3, %v2909_v62  ;;  %v487_v18 = vpop.f32.mrf.mxu3  ;;  %v1163_v63 = vrot.slane %v2849_v37, 1 }
 0x103   :  { %2208 = vmatmul.msk.f32.gmra.mxu0 %vm707_vm3, %v917_v2  ;;  %2221 = vmatmul.msk.f32.gmra.mxu1 %vm707_vm3, %v917_v2  ;;  %v1162_v2 = vrot.slane %v2837_v17, 1 }
 0x104   :  { %v426_v3 = vadd.f32 %v2816_v46, %v410_v0  ;;  %v669_v25 = vadd.f32 %v644_v43, %v538_v42 }
 0x106   :  { %v439_v29 = vmax.f32 %v426_v3, 0.0  ;;  %v682_v4 = vadd.f32 %v2816_v46, %v669_v25  ;;  %v1164_v3 = vsel %vm290_vm2, %v1162_v2, %v1163_v63  ;;  %v1322_v2 = vld [vmem:[#allocation3 + $0x8] sm:$0xff] }
 0x108   :  { %v918_v7 = vrot.slane %v439_v29, 1  ;;  %2195 = vmatmul.msk.f32.gmra.mxu3 %vm707_vm3, %v439_v29  ;;  %v2921_v9 = vmax.f32 %v682_v4, 0.0 }
 0x109   :  { %v392_v10 = vpop.f32.mrf.mxu2  ;;  %v540_v13 = vpop.f32.mrf.mxu0 }
 0x10a   :  { %v411_v12 = vadd.f32 %v392_v10, %v280_v5  ;;  %v919_v14 = vsel %vm290_vm2, %v916_v60, %v918_v7  ;;  %v541_v23 = vadd.f32 %v540_v13, %v484_v61  ;;  %v647_v49 = vpop.f32.mrf.mxu1  ;;  %2180 = vmatmul.msk.f32.gmra.mxu2 %vm707_vm3, %v2921_v9  ;;  %v490_v36 = vpop.f32.mrf.mxu3  ;;  %v1165_v10 = vrot.slane %v2861_v59, 1 }
 0x10b   :  { %2209 = vmatmul.msk.f32.gmra.mxu0 %vm707_vm3, %v919_v14  ;;  %2222 = vmatmul.msk.f32.gmra.mxu1 %vm707_vm3, %v919_v14 }
 0x10c   :  { %v427_v20 = vadd.f32 %v2816_v46, %v411_v12  ;;  %v670_v31 = vadd.f32 %v647_v49, %v541_v23  ;;  %v1166_v14 = vsel %vm290_vm2, %v1163_v63, %v1165_v10  ;;  %v1167_v23 = vrot.slane %v2873_v8, 1 }
 0x10e   :  { %v440_v35 = vmax.f32 %v427_v20, 0.0  ;;  %v683_v6 = vadd.f32 %v2816_v46, %v670_v31  ;;  %v1168_v49 = vsel %vm290_vm2, %v1165_v10, %v1167_v23  ;;  %v1169_v20 = vrot.slane %v2885_v27, 1 }
 0x110   :  { %v920_v24 = vrot.slane %v440_v35, 1  ;;  %2196 = vmatmul.msk.f32.gmra.mxu3 %vm707_vm3, %v440_v35  ;;  %v2933_v26 = vmax.f32 %v683_v6, 0.0  ;;  %v1171_v35 = vrot.slane %v2897_v50, 1 }
 0x111   :  { %v395_v28 = vpop.f32.mrf.mxu2  ;;  %v543_v30 = vpop.f32.mrf.mxu0 }
 0x112   :  { %v412_v11 = vadd.f32 %v395_v28, %v283_v22  ;;  %v921_v32 = vsel %vm290_vm2, %v918_v7, %v920_v24  ;;  %v544_v33 = vadd.f32 %v543_v30, %v487_v18  ;;  %v650_v34 = vpop.f32.mrf.mxu1  ;;  %2181 = vmatmul.msk.f32.gmra.mxu2 %vm707_vm3, %v2933_v26  ;;  %v493_v16 = vpop.f32.mrf.mxu3  ;;  %v1172_v6 = vsel %vm290_vm2, %v1169_v20, %v1171_v35 }
 0x113   :  { %2210 = vmatmul.msk.f32.gmra.mxu0 %vm707_vm3, %v921_v32  ;;  %2223 = vmatmul.msk.f32.gmra.mxu1 %vm707_vm3, %v921_v32 }
 0x114   :  { %v428_v56 = vadd.f32 %v2816_v46, %v412_v11  ;;  %v671_v40 = vadd.f32 %v650_v34, %v544_v33  ;;  %v1175_v11 = vrot.slane %v2921_v9, 1 }
 0x116   :  { %v441_v57 = vmax.f32 %v428_v56, 0.0  ;;  %v684_v15 = vadd.f32 %v2816_v46, %v671_v40 }
 0x118   :  { %v922_v45 = vrot.slane %v441_v57, 1  ;;  %2197 = vmatmul.msk.f32.gmra.mxu3 %vm707_vm3, %v441_v57  ;;  %v2945_v47 = vmax.f32 %v684_v15, 0.0 }
 0x119   :  { %v398_v48 = vpop.f32.mrf.mxu2  ;;  %v546_v52 = vpop.f32.mrf.mxu0 }
 0x11a   :  { %v413_v51 = vadd.f32 %v398_v48, %v286_v38  ;;  %v923_v39 = vsel %vm290_vm2, %v920_v24, %v922_v45  ;;  %v547_v19 = vadd.f32 %v546_v52, %v490_v36  ;;  %v653_v53 = vpop.f32.mrf.mxu1  ;;  %2182 = vmatmul.msk.f32.gmra.mxu2 %vm707_vm3, %v2945_v47  ;;  %v496_v25 = vpop.f32.mrf.mxu3  ;;  %v1173_v24 = vrot.slane %v2909_v62, 1 }
 0x11b   :  { %2211 = vmatmul.msk.f32.gmra.mxu0 %vm707_vm3, %v923_v39  ;;  %2224 = vmatmul.msk.f32.gmra.mxu1 %vm707_vm3, %v923_v39  ;;  %v1179_v40 = vrot.slane %v2945_v47, 1 }
 0x11c   :  { %v429_v54 = vadd.f32 %v2816_v46, %v413_v51  ;;  %v672_v41 = vadd.f32 %v653_v53, %v547_v19  ;;  %v1176_v30 = vsel %vm290_vm2, %v1173_v24, %v1175_v11 }
 0x11e   :  { %v442_v44 = vmax.f32 %v429_v54, 0.0  ;;  %v685_v21 = vadd.f32 %v2816_v46, %v672_v41 }
 0x120   :  { %v924_v55 = vrot.slane %v442_v44, 1  ;;  %2198 = vmatmul.msk.f32.gmra.mxu3 %vm707_vm3, %v442_v44  ;;  %v2955_v58 = vmax.f32 %v685_v21, 0.0  ;;  %v1527_v21 = vld [vmem:[#allocation3 + $0x58] sm:$0xff] }
 0x121   :  { %v549_v60 = vpop.f32.mrf.mxu0  ;;  %1590 = vmatpush.msra.mxu2 %v1527_v21 }
 0x122   :  { %v925_v61 = vsel %vm290_vm2, %v922_v45, %v924_v55  ;;  %v550_v0 = vadd.f32 %v549_v60, %v493_v16  ;;  %v656_v1 = vpop.f32.mrf.mxu1  ;;  %2183 = vmatmul.msk.f32.gmra.mxu2 %vm707_vm3, %v2955_v58  ;;  %v1181_v38 = vrot.slane %v2955_v58, 1  ;;  %v1329_v60 = vld [vmem:[#allocation3 + $0x38] sm:$0xff] }
 0x123   :  { %2212 = vmatmul.msk.f32.gmra.mxu0 %vm707_vm3, %v925_v61  ;;  %2225 = vmatmul.msk.f32.gmra.mxu1 %vm707_vm3, %v925_v61  ;;  %v1324_v61 = vld [vmem:[#allocation3 + $0x18] sm:$0xff] }
 0x124   :  { %v673_v42 = vadd.f32 %v656_v1, %v550_v0  ;;  %v1182_v48 = vsel %vm290_vm2, %v1179_v40, %v1181_v38  ;;  %1405 = vmatpush.msrb.mxu0 %v1329_v60  ;;  %1482 = vmatpush.msrb.mxu1 %v1324_v61  ;;  %v1323_v0 = vld [vmem:[#allocation3 + $0x10] sm:$0xff] }
 0x126   :  { %v686_v43 = vadd.f32 %v2816_v46, %v673_v42  ;;  %1483 = vmatpush.msrb.mxu1 %v1323_v0 }
 0x128   :  { %2240 = vmatmul.msk.f32.vlgmr.msrb.gmra.mxu3 %vm707_vm3, %v1164_v3  ;;  %v2967_v29 = vmax.f32 %v686_v43, 0.0  ;;  %1484 = vmatpush.msrb.mxu1 %v1322_v2  ;;  %v1321_v3 = vld [vmem:[#allocation3] sm:$0xff] }
 0x129   :  { %v552_v4 = vpop.f32.mrf.mxu0 }
 0x12a   :  { %v553_v5 = vadd.f32 %v552_v4, %v496_v25  ;;  %v659_v7 = vpop.f32.mrf.mxu1  ;;  %2184 = vmatmul.msk.f32.gmra.mxu2 %vm707_vm3, %v2967_v29  ;;  %v1183_v51 = vrot.slane %v2967_v29, 1  ;;  %1485 = vmatpush.msrb.mxu1 %v1321_v3 }
 0x12b   :  { %2213 = vmatmul.msk.f32.gmra.mxu0 %vm707_vm3, %v924_v55  ;;  %2226 = vmatmul.msk.f32.gmra.mxu1 %vm707_vm3, %v924_v55 }
 0x12c   :  { %v674_v12 = vadd.f32 %v659_v7, %v553_v5  ;;  %v1184_v39 = vsel %vm290_vm2, %v1181_v38, %v1183_v51  ;;  %v1328_v5 = vld [vmem:[#allocation3 + $0x30] sm:$0xff] }
 0x12d   :  { %v1526_v7 = vld [vmem:[#allocation3 + $0x50] sm:$0xff]  ;;  %1406 = vmatpush.msrb.mxu0 %v1328_v5 }
 0x12e   :  { %v687_v13 = vadd.f32 %v2816_v46, %v674_v12  ;;  %v1170_v46 = vsel %vm290_vm2, %v1167_v23, %v1169_v20  ;;  %1591 = vmatpush.msra.mxu2 %v1526_v7  ;;  %v1327_v12 = vld [vmem:[#allocation3 + $0x28] sm:$0xff]  ;;  %v1524_v23 = vld [vmem:[#allocation3 + $0x40] sm:$0xff] }
 0x12f   :  { %1407 = vmatpush.msrb.mxu0 %v1327_v12 }
 0x130   :  { %2241 = vmatmul.msk.f32.gmra.mxu3 %vm707_vm3, %v1166_v14  ;;  %v2977_v18 = vmax.f32 %v687_v13, 0.0  ;;  %v1525_v13 = vld [vmem:[#allocation3 + $0x48] sm:$0xff] }
 0x131   :  { %1592 = vmatpush.msra.mxu2 %v1525_v13 }
 0x132   :  { %2185 = vmatmul.msk.f32.gmra.mxu2 %vm707_vm3, %v2977_v18  ;;  %v1185_v19 = vrot.slane %v2977_v18, 1 }
 0x133   :  { %1593 = vmatpush.msra.mxu2 %v1524_v23 }
 0x134   :  { %v1186_v54 = vsel %vm290_vm2, %v1183_v51, %v1185_v19 }
 0x138   :  { %2242 = vmatmul.msk.f32.gmra.mxu3 %vm707_vm3, %v1168_v49 }
 0x13a   :  { %2227 = vmatmul.msk.f32.vlgmr.msrb.gmra.mxu2 %vm707_vm3, %v2837_v17  ;;  %v1174_v17 = vsel %vm290_vm2, %v1171_v35, %v1173_v24 }
 0x140   :  { %2243 = vmatmul.msk.f32.gmra.mxu3 %vm707_vm3, %v1170_v46 }
 0x142   :  { %2228 = vmatmul.msk.f32.gmra.mxu2 %vm707_vm3, %v2849_v37 }
 0x143   :  { %v859_v31 = vpop.f32.mrf.mxu3 }
 0x148   :  { %2244 = vmatmul.msk.f32.gmra.mxu3 %vm707_vm3, %v1172_v6  ;;  %v969_v1 = vpop.f32.mrf.mxu0  ;;  %v1067_v42 = vpop.f32.mrf.mxu1  ;;  %v3090_v6 = vld [vmem:[%s3360_s5] ss:$0 sm:$0xff] }
 0x14a   :  { %2229 = vmatmul.msk.f32.gmra.mxu2 %vm707_vm3, %v2861_v59  ;;  %v1177_v59 = vrot.slane %v2933_v26, 1 }
 0x14b   :  { %v862_v22 = vpop.f32.mrf.mxu3 }
 0x14c   :  { %v1178_v56 = vsel %vm290_vm2, %v1175_v11, %v1177_v59  ;;  %v1180_v15 = vsel %vm290_vm2, %v1177_v59, %v1179_v40 }
 0x150   :  { %2245 = vmatmul.msk.f32.gmra.mxu3 %vm707_vm3, %v1174_v17  ;;  %v1070_v10 = vpop.f32.mrf.mxu1 }
 0x152   :  { %2230 = vmatmul.msk.f32.gmra.mxu2 %vm707_vm3, %v2873_v8 }
 0x153   :  { %v2999_v28 = vpop.f32.mrf.mxu3 }
 0x155   :  { %v764_v37 = vpop.f32.mrf.mxu2 }
 0x156   :  { %v3005_v32 = vadd.f32 %v859_v31, %v764_v37 }
 0x158   :  { %2246 = vmatmul.msk.f32.gmra.mxu3 %vm707_vm3, %v1176_v30  ;;  %v1073_v46 = vpop.f32.mrf.mxu1  ;;  %v1008_v35 = vadd.f32 %v969_v1, %v3005_v32 }
 0x15a   :  { %2231 = vmatmul.msk.f32.gmra.mxu2 %vm707_vm3, %v2885_v27  ;;  %v1024_v17 = vadd.f32 %v3090_v6, %v1008_v35 }
 0x15b   :  { %v3008_v33 = vpop.f32.mrf.mxu3 }
 0x15d   :  { %v767_v34 = vpop.f32.mrf.mxu2 }
 0x15e   :  { %v3014_v36 = vadd.f32 %v862_v22, %v767_v34  ;;  %v1037_v34 = vmax.f32 %v1024_v17, 0.0 }
 0x160   :  { %2247 = vmatmul.msk.f32.gmra.mxu3 %vm707_vm3, %v1178_v56  ;;  %v1076_v59 = vpop.f32.mrf.mxu1 }
 0x162   :  { %2232 = vmatmul.msk.f32.gmra.mxu2 %vm707_vm3, %v2897_v50 }
 0x163   :  { %v3017_v8 = vpop.f32.mrf.mxu3 }
 0x165   :  { %v3022_v57 = vpop.f32.mrf.mxu2 }
 0x166   :  { %v866_v51 = vadd.f32 %v2999_v28, %v3022_v57 }
 0x168   :  { %2248 = vmatmul.msk.f32.gmra.mxu3 %vm707_vm3, %v1180_v15  ;;  %v1079_v0 = vpop.f32.mrf.mxu1 }
 0x16a   :  { %2233 = vmatmul.msk.f32.gmra.mxu2 %vm707_vm3, %v2909_v62 }
 0x16b   :  { %v3026_v27 = vpop.f32.mrf.mxu3 }
 0x16d   :  { %v3031_v45 = vpop.f32.mrf.mxu2 }
 0x16e   :  { %v869_v28 = vadd.f32 %v3008_v33, %v3031_v45 }
 0x170   :  { %2249 = vmatmul.msk.f32.gmra.mxu3 %vm707_vm3, %v1182_v48 }
 0x172   :  { %2234 = vmatmul.msk.f32.gmra.mxu2 %vm707_vm3, %v2921_v9 }
 0x173   :  { %v3035_v50 = vpop.f32.mrf.mxu3 }
 0x175   :  { %v3040_v52 = vpop.f32.mrf.mxu2 }
 0x178   :  { %2250 = vmatmul.msk.f32.gmra.mxu3 %vm707_vm3, %v1184_v39 }
 0x17a   :  { %2235 = vmatmul.msk.f32.gmra.mxu2 %vm707_vm3, %v2933_v26 }
 0x17b   :  { %v3044_v62 = vpop.f32.mrf.mxu3 }
 0x17d   :  { %v3049_v53 = vpop.f32.mrf.mxu2 }
 0x180   :  { %2251 = vmatmul.msk.f32.gmra.mxu3 %vm707_vm3, %v1186_v54 }
 0x182   :  { %2236 = vmatmul.msk.f32.gmra.mxu2 %vm707_vm3, %v2945_v47 }
 0x183   :  { %v3053_v9 = vpop.f32.mrf.mxu3 }
 0x185   :  { %v3057_v41 = vpop.f32.mrf.mxu2 }
 0x188   :  { %2252 = vmatmul.msk.f32.gmra.mxu3 %vm707_vm3, %v1185_v19 }
 0x18a   :  { %2237 = vmatmul.msk.f32.gmra.mxu2 %vm707_vm3, %v2955_v58 }
 0x18b   :  { %v3060_v44 = vpop.f32.mrf.mxu3 }
 0x18d   :  { %v3064_v26 = vpop.f32.mrf.mxu2 }
 0x192   :  { %2238 = vmatmul.msk.f32.gmra.mxu2 %vm707_vm3, %v2967_v29  ;;  %v972_v29 = vpop.f32.mrf.mxu0 }
 0x193   :  { %v3066_v16 = vpop.f32.mrf.mxu3  ;;  %v1009_v56 = vadd.f32 %v972_v29, %v3014_v36 }
 0x195   :  { %v3070_v55 = vpop.f32.mrf.mxu2  ;;  %v1025_v39 = vadd.f32 %v3090_v6, %v1009_v56 }
 0x197   :  { %v1038_v61 = vmax.f32 %v1025_v39, 0.0 }
 0x19a   :  { %2239 = vmatmul.msk.f32.gmra.mxu2 %vm707_vm3, %v2977_v18  ;;  %v1326_v18 = vld [vmem:[#allocation3 + $0x20] sm:$0xff]  ;;  %v975_v20 = vpop.f32.mrf.mxu0 }
 0x19b   :  { %v3072_v47 = vpop.f32.mrf.mxu3  ;;  %1408 = vmatpush.msrb.mxu0 %v1326_v18  ;;  %v1010_v21 = vadd.f32 %v975_v20, %v866_v51  ;;  %v875_v51 = vadd.f32 %v3026_v27, %v3049_v53 }
 0x19d   :  { %v3076_v63 = vpop.f32.mrf.mxu2  ;;  %v1026_v3 = vadd.f32 %v3090_v6, %v1010_v21 }
 0x19f   :  { %v1039_v33 = vmax.f32 %v1026_v3, 0.0 }
 0x1a2   :  { %v978_v37 = vpop.f32.mrf.mxu0 }
 0x1a3   :  { %v3078_v58 = vpop.f32.mrf.mxu3  ;;  %v1011_v18 = vadd.f32 %v978_v37, %v869_v28 }
 0x1a5   :  { %v3080_v43 = vpop.f32.mrf.mxu2  ;;  %v1027_v35 = vadd.f32 %v3090_v6, %v1011_v18 }
 0x1aa   :  { %v981_v60 = vpop.f32.mrf.mxu0 }
 0x1ab   :  { %v1230_v25 = vpop.f32.mrf.mxu3 }
 0x1ad   :  { %v3082_v4 = vpop.f32.mrf.mxu2 }
 0x1b2   :  { %v984_v23 = vpop.f32.mrf.mxu0 }
 0x1b3   :  { %v1233_v14 = vpop.f32.mrf.mxu3 }
 0x1b5   :  { %v3084_v49 = vpop.f32.mrf.mxu2 }
 0x1bb   :  { %v1236_v31 = vpop.f32.mrf.mxu3 }
 0x1bd   :  { %v1123_v22 = vpop.f32.mrf.mxu2 }
 0x1be   :  { %v1124_v24 = vadd.f32 %v1123_v22, %v1067_v42  ;;  %v1082_v22 = vpop.f32.mrf.mxu1 }
 0x1c0   :  { %v1269_v11 = vadd.f32 %v1230_v25, %v1124_v24  ;;  %v872_v24 = vadd.f32 %v3017_v8, %v3040_v52 }
 0x1c2   :  { %v1282_v30 = vadd.f32 %v3090_v6, %v1269_v11 }
 0x1c3   :  { %v1239_v15 = vpop.f32.mrf.mxu3 }
 0x1c4   :  { %v1295_v40 = vmax.f32 %v1282_v30, 0.0 }
 0x1c5   :  { %v1126_v32 = vpop.f32.mrf.mxu2 }
 0x1c6   :  { %v1308_v38 = vmax.f32 %v1037_v34, %v1295_v40  ;;  %v1127_v48 = vadd.f32 %v1126_v32, %v1070_v10  ;;  %v1012_v32 = vadd.f32 %v981_v60, %v872_v24 }
 0x1c8   :  { %v1270_v19 = vadd.f32 %v1233_v14, %v1127_v48  ;;  %2265 = vmatmul.msk.f32.vlgmr.msrb.gmra.mxu1 %vm1368_vm4, %v1308_v38  ;;  %v1343_v57 = vrot.slane %v1308_v38, 1  ;;  %v1529_v29 = vrot.slane %v1308_v38, 2  ;;  %v987_v48 = vpop.f32.mrf.mxu0  ;;  %v1028_v39 = vadd.f32 %v3090_v6, %v1012_v32 }
 0x1ca   :  { %v1283_v54 = vadd.f32 %v3090_v6, %v1270_v19  ;;  %v1041_v27 = vmax.f32 %v1028_v39, 0.0 }
 0x1cb   :  { %v1242_v25 = vpop.f32.mrf.mxu3 }
 0x1cc   :  { %v1296_v36 = vmax.f32 %v1283_v54, 0.0 }
 0x1cd   :  { %v1129_v1 = vpop.f32.mrf.mxu2 }
 0x1ce   :  { %v1130_v2 = vadd.f32 %v1129_v1, %v1073_v46  ;;  %v1309_v42 = vmax.f32 %v1038_v61, %v1296_v36  ;;  %v1085_v61 = vpop.f32.mrf.mxu1 }
 0x1d0   :  { %v1271_v5 = vadd.f32 %v1236_v31, %v1130_v2  ;;  %v1344_v7 = vrot.slane %v1309_v42, 1  ;;  %2266 = vmatmul.msk.f32.gmra.mxu1 %vm1368_vm4, %v1309_v42  ;;  %v1530_v10 = vrot.slane %v1309_v42, 2  ;;  %v1013_v2 = vadd.f32 %v984_v23, %v875_v51 }
 0x1d2   :  { %v1284_v12 = vadd.f32 %v3090_v6, %v1271_v5  ;;  %v1345_v13 = vsel %vm290_vm2, %v1343_v57, %v1344_v7  ;;  %v1531_v14 = vsel %vm1528_vm5, %v1529_v29, %v1530_v10  ;;  %v1029_v57 = vadd.f32 %v3090_v6, %v1013_v2 }
 0x1d3   :  { %2253 = vmatmul.msk.f32.vlgmr.msrb.gmra.mxu0 %vm1368_vm4, %v1345_v13  ;;  %2277 = vmatmul.msk.f32.vlgmr.msra.gmra.mxu2 %vm1368_vm4, %v1531_v14  ;;  %v1245_v30 = vpop.f32.mrf.mxu3 }
 0x1d4   :  { %v1297_v45 = vmax.f32 %v1284_v12, 0.0 }
 0x1d5   :  { %v1132_v20 = vpop.f32.mrf.mxu2 }
 0x1d6   :  { %v1310_v46 = vmax.f32 %v1039_v33, %v1297_v45  ;;  %v1133_v31 = vadd.f32 %v1132_v20, %v1076_v59  ;;  %v1040_v59 = vmax.f32 %v1027_v35, 0.0  ;;  %v1088_v18 = vpop.f32.mrf.mxu1  ;;  %v1042_v33 = vmax.f32 %v1029_v57, 0.0 }
 0x1d8   :  { %v1272_v17 = vadd.f32 %v1239_v15, %v1133_v31  ;;  %2267 = vmatmul.msk.f32.gmra.mxu1 %vm1368_vm4, %v1310_v46  ;;  %v1346_v11 = vrot.slane %v1310_v46, 1  ;;  %v1532_v37 = vrot.slane %v1310_v46, 2  ;;  %v881_v31 = vadd.f32 %v3044_v62, %v3064_v26 }
 0x1da   :  { %v1285_v34 = vadd.f32 %v3090_v6, %v1272_v17  ;;  %v1347_v56 = vsel %vm290_vm2, %v1344_v7, %v1346_v11  ;;  %v1533_v40 = vsel %vm1528_vm5, %v1530_v10, %v1532_v37  ;;  %v990_v10 = vpop.f32.mrf.mxu0 }
 0x1db   :  { %2254 = vmatmul.msk.f32.gmra.mxu0 %vm1368_vm4, %v1347_v56  ;;  %2278 = vmatmul.msk.f32.gmra.mxu2 %vm1368_vm4, %v1533_v40  ;;  %v1015_v56 = vadd.f32 %v990_v10, %v881_v31 }
 0x1dc   :  { %v1298_v38 = vmax.f32 %v1285_v34, 0.0 }
 0x1dd   :  { %v1135_v8 = vpop.f32.mrf.mxu2 }
 0x1de   :  { %v1311_v52 = vmax.f32 %v1040_v59, %v1298_v38  ;;  %v1136_v15 = vadd.f32 %v1135_v8, %v1079_v0  ;;  %v1248_v0 = vpop.f32.mrf.mxu3  ;;  %v1091_v40 = vpop.f32.mrf.mxu1  ;;  %v1031_v8 = vadd.f32 %v3090_v6, %v1015_v56 }
 0x1e0   :  { %v1273_v19 = vadd.f32 %v1242_v25, %v1136_v15  ;;  %2268 = vmatmul.msk.f32.gmra.mxu1 %vm1368_vm4, %v1311_v52  ;;  %v1348_v54 = vrot.slane %v1311_v52, 1  ;;  %v1534_v21 = vrot.slane %v1311_v52, 2  ;;  %v878_v25 = vadd.f32 %v3035_v50, %v3057_v41 }
 0x1e1   :  { %v884_v15 = vadd.f32 %v3053_v9, %v3070_v55 }
 0x1e2   :  { %v1286_v36 = vadd.f32 %v3090_v6, %v1273_v19  ;;  %v1349_v60 = vsel %vm290_vm2, %v1346_v11, %v1348_v54  ;;  %v1535_v1 = vsel %vm1528_vm5, %v1532_v37, %v1534_v21  ;;  %v1014_v45 = vadd.f32 %v987_v48, %v878_v25  ;;  %v993_v34 = vpop.f32.mrf.mxu0 }
 0x1e3   :  { %2255 = vmatmul.msk.f32.gmra.mxu0 %vm1368_vm4, %v1349_v60  ;;  %2279 = vmatmul.msk.f32.gmra.mxu2 %vm1368_vm4, %v1535_v1 }
 0x1e4   :  { %v1299_v53 = vmax.f32 %v1286_v36, 0.0  ;;  %v1030_v35 = vadd.f32 %v3090_v6, %v1014_v45  ;;  %v1016_v36 = vadd.f32 %v993_v34, %v884_v15 }
 0x1e5   :  { %v1138_v42 = vpop.f32.mrf.mxu2 }
 0x1e6   :  { %v1312_v3 = vmax.f32 %v1041_v27, %v1299_v53  ;;  %v1139_v28 = vadd.f32 %v1138_v42, %v1082_v22  ;;  %v1251_v41 = vpop.f32.mrf.mxu3  ;;  %v1043_v62 = vmax.f32 %v1030_v35, 0.0  ;;  %v887_v27 = vadd.f32 %v3060_v44, %v3076_v63 }
 0x1e7   :  { %v1032_v53 = vadd.f32 %v3090_v6, %v1016_v36 }
 0x1e8   :  { %v1274_v29 = vadd.f32 %v1245_v30, %v1139_v28  ;;  %2269 = vmatmul.msk.f32.gmra.mxu1 %vm1368_vm4, %v1312_v3  ;;  %v1350_v5 = vrot.slane %v1312_v3, 1  ;;  %v1536_v7 = vrot.slane %v1312_v3, 2 }
 0x1e9   :  { %v1045_v44 = vmax.f32 %v1032_v53, 0.0 }
 0x1ea   :  { %v1287_v12 = vadd.f32 %v3090_v6, %v1274_v29  ;;  %v1351_v13 = vsel %vm290_vm2, %v1348_v54, %v1350_v5  ;;  %v1537_v14 = vsel %vm1528_vm5, %v1534_v21, %v1536_v7  ;;  %v996_v1 = vpop.f32.mrf.mxu0 }
 0x1eb   :  { %2256 = vmatmul.msk.f32.gmra.mxu0 %vm1368_vm4, %v1351_v13  ;;  %2280 = vmatmul.msk.f32.gmra.mxu2 %vm1368_vm4, %v1537_v14 }
 0x1ec   :  { %v1300_v50 = vmax.f32 %v1287_v12, 0.0 }
 0x1ed   :  { %v1141_v23 = vpop.f32.mrf.mxu2 }
 0x1ee   :  { %v1313_v20 = vmax.f32 %v1042_v33, %v1300_v50  ;;  %v1142_v46 = vadd.f32 %v1141_v23, %v1085_v61  ;;  %v1254_v52 = vpop.f32.mrf.mxu3  ;;  %v1044_v61 = vmax.f32 %v1031_v8, 0.0  ;;  %v890_v33 = vadd.f32 %v3066_v16, %v3080_v43 }
 0x1f0   :  { %v1275_v22 = vadd.f32 %v1248_v0, %v1142_v46  ;;  %2270 = vmatmul.msk.f32.gmra.mxu1 %vm1368_vm4, %v1313_v20  ;;  %v1352_v24 = vrot.slane %v1313_v20, 1  ;;  %v1538_v17 = vrot.slane %v1313_v20, 2  ;;  %v1094_v0 = vpop.f32.mrf.mxu1 }
 0x1f2   :  { %v1288_v11 = vadd.f32 %v3090_v6, %v1275_v22  ;;  %v1353_v37 = vsel %vm290_vm2, %v1350_v5, %v1352_v24  ;;  %v1539_v30 = vsel %vm1528_vm5, %v1536_v7, %v1538_v17  ;;  %v1017_v7 = vadd.f32 %v996_v1, %v887_v27  ;;  %v999_v14 = vpop.f32.mrf.mxu0 }
 0x1f3   :  { %2257 = vmatmul.msk.f32.gmra.mxu0 %vm1368_vm4, %v1353_v37  ;;  %2281 = vmatmul.msk.f32.gmra.mxu2 %vm1368_vm4, %v1539_v30  ;;  %v893_v37 = vadd.f32 %v3072_v47, %v3082_v4 }
 0x1f4   :  { %v1301_v26 = vmax.f32 %v1288_v11, 0.0 }
 0x1f5   :  { %v1144_v59 = vpop.f32.mrf.mxu2 }
 0x1f6   :  { %v1314_v32 = vmax.f32 %v1043_v62, %v1301_v26  ;;  %v1145_v38 = vadd.f32 %v1144_v59, %v1088_v18  ;;  %v1257_v57 = vpop.f32.mrf.mxu3  ;;  %v1033_v18 = vadd.f32 %v3090_v6, %v1017_v7 }
 0x1f8   :  { %v1276_v48 = vadd.f32 %v1251_v41, %v1145_v38  ;;  %2271 = vmatmul.msk.f32.gmra.mxu1 %vm1368_vm4, %v1314_v32  ;;  %v1354_v51 = vrot.slane %v1314_v32, 1  ;;  %v1540_v39 = vrot.slane %v1314_v32, 2  ;;  %v1097_v23 = vpop.f32.mrf.mxu1  ;;  %v1046_v22 = vmax.f32 %v1033_v18, 0.0 }
 0x1fa   :  { %v1289_v19 = vadd.f32 %v3090_v6, %v1276_v48  ;;  %v1355_v54 = vsel %vm290_vm2, %v1352_v24, %v1354_v51  ;;  %v1541_v21 = vsel %vm1528_vm5, %v1538_v17, %v1540_v39  ;;  %v1018_v24 = vadd.f32 %v999_v14, %v890_v33  ;;  %v1002_v26 = vpop.f32.mrf.mxu0  ;;  %v1676_v33 = vld [vmem:[%s3363_s8 + $0x28] sm:$0x1f] }
 0x1fb   :  { %2258 = vmatmul.msk.f32.gmra.mxu0 %vm1368_vm4, %v1355_v54  ;;  %2282 = vmatmul.msk.f32.gmra.mxu2 %vm1368_vm4, %v1541_v21  ;;  %v1019_v8 = vadd.f32 %v1002_v26, %v893_v37 }
 0x1fc   :  { %v1302_v60 = vmax.f32 %v1289_v19, 0.0  ;;  %v1034_v30 = vadd.f32 %v3090_v6, %v1018_v24  ;;  %v896_v19 = vadd.f32 %v3078_v58, %v3084_v49  ;;  %2308 = vmatpush.msk.msra.mxu0 %vm1744_vm6, %v1676_v33  ;;  %v2324_v24 = vld [vmem:[%s3363_s8 + $0x78] sm:$0xff] }
 0x1fd   :  { %v1147_v9 = vpop.f32.mrf.mxu2 }
 0x1fe   :  { %v1315_v55 = vmax.f32 %v1044_v61, %v1302_v60  ;;  %v1148_v2 = vadd.f32 %v1147_v9, %v1091_v40  ;;  %v1260_v35 = vpop.f32.mrf.mxu3  ;;  %v1047_v47 = vmax.f32 %v1034_v30, 0.0  ;;  %v2289_v30 = vld [vmem:[%s3363_s8 + $0x30] sm:$0xff] }
 0x200   :  { %v1277_v42 = vadd.f32 %v1254_v52, %v1148_v2  ;;  %2272 = vmatmul.msk.f32.gmra.mxu1 %vm1368_vm4, %v1315_v55  ;;  %v1356_v3 = vrot.slane %v1315_v55, 1  ;;  %v1542_v28 = vrot.slane %v1315_v55, 2  ;;  %v1100_v38 = vpop.f32.mrf.mxu1 }
 0x202   :  { %v1290_v25 = vadd.f32 %v3090_v6, %v1277_v42  ;;  %v1357_v29 = vsel %vm290_vm2, %v1354_v51, %v1356_v3  ;;  %v1543_v5 = vsel %vm1528_vm5, %v1540_v39, %v1542_v28  ;;  %v1035_v39 = vadd.f32 %v3090_v6, %v1019_v8  ;;  %v1005_v9 = vpop.f32.mrf.mxu0 }
 0x203   :  { %2259 = vmatmul.msk.f32.gmra.mxu0 %vm1368_vm4, %v1357_v29  ;;  %2283 = vmatmul.msk.f32.gmra.mxu2 %vm1368_vm4, %v1543_v5  ;;  %v1020_v2 = vadd.f32 %v1005_v9, %v896_v19 }
 0x204   :  { %v1303_v63 = vmax.f32 %v1290_v25, 0.0  ;;  %v1048_v55 = vmax.f32 %v1035_v39, 0.0 }
 0x205   :  { %v1150_v10 = vpop.f32.mrf.mxu2 }
 0x206   :  { %v1316_v12 = vmax.f32 %v1045_v44, %v1303_v63  ;;  %v1151_v13 = vadd.f32 %v1150_v10, %v1094_v0  ;;  %v1263_v52 = vpop.f32.mrf.mxu3  ;;  %v2294_v10 = vld [vmem:[%s3363_s8 + $0x58] sm:$0x1f] }
 0x207   :  { %2295 = vmatpush.msk.msra.mxu3 %vm1744_vm6, %v2294_v10 }
 0x208   :  { %v1278_v45 = vadd.f32 %v1257_v57, %v1151_v13  ;;  %2273 = vmatmul.msk.f32.gmra.mxu1 %vm1368_vm4, %v1316_v12  ;;  %v1358_v50 = vrot.slane %v1316_v12, 1  ;;  %v1544_v41 = vrot.slane %v1316_v12, 2  ;;  %v1103_v58 = vpop.f32.mrf.mxu1 }
 0x20a   :  { %v1291_v20 = vadd.f32 %v3090_v6, %v1278_v45  ;;  %v1359_v46 = vsel %vm290_vm2, %v1356_v3, %v1358_v50  ;;  %v1545_v31 = vsel %vm1528_vm5, %v1542_v28, %v1544_v41  ;;  %v1036_v3 = vadd.f32 %v3090_v6, %v1020_v2  ;;  %v1675_v45 = vld [vmem:[%s3363_s8 + $0x20] sm:$0xff] }
 0x20b   :  { %2260 = vmatmul.msk.f32.gmra.mxu0 %vm1368_vm4, %v1359_v46  ;;  %2284 = vmatmul.msk.f32.gmra.mxu2 %vm1368_vm4, %v1545_v31  ;;  %v2326_v46 = vld [vmem:[%s3363_s8 + $0x88] sm:$0x1f]  ;;  %v2293_v31 = vld [vmem:[%s3363_s8 + $0x50] sm:$0xff] }
 0x20c   :  { %v1304_v16 = vmax.f32 %v1291_v20, 0.0  ;;  %v1049_v44 = vmax.f32 %v1036_v3, 0.0  ;;  %1839 = vmatpush.msra.mxu0 %v1675_v45  ;;  %v1671_v20 = vld [vmem:[%s3363_s8] sm:$0xff]  ;;  %2327 = vmatpush.msk.msra.mxu1 %vm1744_vm6, %v2326_v46 }
 0x20d   :  { %v1153_v43 = vpop.f32.mrf.mxu2  ;;  %1759 = vmatpush.msra.mxu3 %v2293_v31 }
 0x20e   :  { %v1317_v17 = vmax.f32 %v1046_v22, %v1304_v16  ;;  %v1154_v11 = vadd.f32 %v1153_v43, %v1097_v23  ;;  %v1266_v42 = vpop.f32.mrf.mxu3  ;;  %v1672_v23 = vld [vmem:[%s3363_s8 + $0x8] sm:$0xff]  ;;  %v2291_v16 = vld [vmem:[%s3363_s8 + $0x40] sm:$0xff]  ;;  %v2323_v43 = vld [vmem:[%s3363_s8 + $0x70] sm:$0xff] }
 0x20f   :  { %v2292_v22 = vld [vmem:[%s3363_s8 + $0x48] sm:$0xff] }
 0x210   :  { %v1279_v34 = vadd.f32 %v1260_v35, %v1154_v11  ;;  %2274 = vmatmul.msk.f32.gmra.mxu1 %vm1368_vm4, %v1317_v17  ;;  %v1360_v56 = vrot.slane %v1317_v17, 1  ;;  %v1546_v62 = vrot.slane %v1317_v17, 2  ;;  %v2325_v35 = vld [vmem:[%s3363_s8 + $0x80] sm:$0xff]  ;;  %1760 = vmatpush.msra.mxu3 %v2292_v22  ;;  %v2290_v17 = vld [vmem:[%s3363_s8 + $0x38] sm:$0xff]  ;;  %v2322_v11 = vld [vmem:[%s3363_s8 + $0x68] sm:$0xff] }
 0x211   :  { %1949 = vmatpush.msra.mxu1 %v2325_v35 }
 0x212   :  { %v1292_v40 = vadd.f32 %v3090_v6, %v1279_v34  ;;  %v1361_v59 = vsel %vm290_vm2, %v1358_v50, %v1360_v56  ;;  %v1547_v32 = vsel %vm1528_vm5, %v1544_v41, %v1546_v62  ;;  %v1674_v50 = vld [vmem:[%s3363_s8 + $0x18] sm:$0xff]  ;;  %v1673_v41 = vld [vmem:[%s3363_s8 + $0x10] sm:$0xff]  ;;  %1761 = vmatpush.msra.mxu3 %v2291_v16  ;;  %v2321_v34 = vld [vmem:[%s3363_s8 + $0x60] sm:$0xff] }
 0x213   :  { %2261 = vmatmul.msk.f32.gmra.mxu0 %vm1368_vm4, %v1361_v59  ;;  %2285 = vmatmul.msk.f32.gmra.mxu2 %vm1368_vm4, %v1547_v32  ;;  %v3261_v59 = vld [vmem:[%s3362_s7] ss:$0 sm:$0xff] }
 0x214   :  { %v1305_v4 = vmax.f32 %v1292_v40, 0.0  ;;  %1840 = vmatpush.msra.mxu0 %v1674_v50  ;;  %1950 = vmatpush.msra.mxu1 %v2324_v24 }
 0x215   :  { %v1156_v15 = vpop.f32.mrf.mxu2  ;;  %1762 = vmatpush.msra.mxu3 %v2290_v17 }
 0x216   :  { %v1318_v48 = vmax.f32 %v1047_v47, %v1305_v4  ;;  %v1157_v51 = vadd.f32 %v1156_v15, %v1100_v38  ;;  %1841 = vmatpush.msra.mxu0 %v1673_v41  ;;  %1951 = vmatpush.msra.mxu1 %v2323_v43 }
 0x217   :  { %1763 = vmatpush.msra.mxu3 %v2289_v30 }
 0x218   :  { %v1280_v54 = vadd.f32 %v1263_v52, %v1157_v51  ;;  %2275 = vmatmul.msk.f32.gmra.mxu1 %vm1368_vm4, %v1318_v48  ;;  %v1362_v21 = vrot.slane %v1318_v48, 1  ;;  %v1548_v61 = vrot.slane %v1318_v48, 2  ;;  %1842 = vmatpush.msra.mxu0 %v1672_v23 }
 0x219   :  { %1952 = vmatpush.msra.mxu1 %v2322_v11 }
 0x21a   :  { %v1293_v36 = vadd.f32 %v3090_v6, %v1280_v54  ;;  %v1363_v60 = vsel %vm290_vm2, %v1360_v56, %v1362_v21  ;;  %v1549_v1 = vsel %vm1528_vm5, %v1546_v62, %v1548_v61  ;;  %1843 = vmatpush.msra.mxu0 %v1671_v20 }
 0x21b   :  { %2262 = vmatmul.msk.f32.gmra.mxu0 %vm1368_vm4, %v1363_v60  ;;  %2286 = vmatmul.msk.f32.gmra.mxu2 %vm1368_vm4, %v1549_v1 }
 0x21c   :  { %v1306_v0 = vmax.f32 %v1293_v36, 0.0  ;;  %1953 = vmatpush.msra.mxu1 %v2321_v34 }
 0x21d   :  { %v1159_v49 = vpop.f32.mrf.mxu2 }
 0x21e   :  { %v1319_v27 = vmax.f32 %v1048_v55, %v1306_v0  ;;  %v1160_v53 = vadd.f32 %v1159_v49, %v1103_v58 }
 0x220   :  { %v1281_v28 = vadd.f32 %v1266_v42, %v1160_v53  ;;  %2276 = vmatmul.msk.f32.gmra.mxu1 %vm1368_vm4, %v1319_v27  ;;  %v1364_v57 = vrot.slane %v1319_v27, 1  ;;  %v1550_v25 = vrot.slane %v1319_v27, 2 }
 0x222   :  { %v1294_v29 = vadd.f32 %v3090_v6, %v1281_v28  ;;  %v1365_v5 = vsel %vm290_vm2, %v1362_v21, %v1364_v57  ;;  %v1551_v7 = vsel %vm1528_vm5, %v1548_v61, %v1550_v25 }
 0x223   :  { %2263 = vmatmul.msk.f32.gmra.mxu0 %vm1368_vm4, %v1365_v5  ;;  %2287 = vmatmul.msk.f32.gmra.mxu2 %vm1368_vm4, %v1551_v7 }
 0x224   :  { %v1307_v63 = vmax.f32 %v1294_v29, 0.0 }
 0x226   :  { %v1320_v12 = vmax.f32 %v1049_v44, %v1307_v63 }
 0x228   :  { %v1366_v13 = vrot.slane %v1320_v12, 1  ;;  %v1552_v6 = vrot.slane %v1320_v12, 2 }
 0x22a   :  { %v1367_v14 = vsel %vm290_vm2, %v1364_v57, %v1366_v13  ;;  %v1553_v18 = vsel %vm1528_vm5, %v1550_v25, %v1552_v6 }
 0x22b   :  { %2264 = vmatmul.msk.f32.gmra.mxu0 %vm1368_vm4, %v1367_v14  ;;  %2288 = vmatmul.msk.f32.gmra.mxu2 %vm1368_vm4, %v1553_v18 }
 0x245   :  { %v1487_v37 = vpop.f32.mrf.mxu1 }
 0x24d   :  { %v1490_v56 = vpop.f32.mrf.mxu1 }
 0x250   :  { %v1410_v62 = vpop.f32.mrf.mxu0 }
 0x251   :  { %v1488_v26 = vadd.f32 %v1487_v37, %v1410_v62 }
 0x255   :  { %v1493_v40 = vpop.f32.mrf.mxu1 }
 0x256   :  { %v1595_v32 = vpop.f32.mrf.mxu2 }
 0x257   :  { %v1631_v38 = vadd.f32 %v1595_v32, %v1488_v26 }
 0x258   :  { %v1413_v8 = vpop.f32.mrf.mxu0 }
 0x259   :  { %v1647_v47 = vadd.f32 %v3261_v59, %v1631_v38  ;;  %v1491_v52 = vadd.f32 %v1490_v56, %v1413_v8 }
 0x25b   :  { %v1659_v4 = vmax.f32 %v1647_v47, 0.0 }
 0x25d   :  { %v1496_v15 = vpop.f32.mrf.mxu1  ;;  %2309 = vmatmul.msk.f32.vlgmr.msra.gmra.mxu0 %vm1719_vm7, %v1659_v4  ;;  %v1696_v21 = vrot.slane %v1659_v4, 1  ;;  %v1888_v61 = vrot.slane %v1659_v4, 2 }
 0x25e   :  { %v1598_v48 = vpop.f32.mrf.mxu2 }
 0x25f   :  { %v1632_v51 = vadd.f32 %v1598_v48, %v1491_v52 }
 0x260   :  { %v1416_v39 = vpop.f32.mrf.mxu0 }
 0x261   :  { %v1648_v19 = vadd.f32 %v3261_v59, %v1632_v51  ;;  %v1494_v1 = vadd.f32 %v1493_v40, %v1416_v39 }
 0x263   :  { %v1660_v54 = vmax.f32 %v1648_v19, 0.0 }
 0x265   :  { %v1697_v36 = vrot.slane %v1660_v54, 1  ;;  %v1889_v60 = vrot.slane %v1660_v54, 2  ;;  %2310 = vmatmul.msk.f32.gmra.mxu0 %vm1719_vm7, %v1660_v54  ;;  %v1499_v9 = vpop.f32.mrf.mxu1 }
 0x266   :  { %v1601_v55 = vpop.f32.mrf.mxu2 }
 0x267   :  { %v1633_v2 = vadd.f32 %v1601_v55, %v1494_v1  ;;  %v1698_v0 = vsel %vm290_vm2, %v1696_v21, %v1697_v36  ;;  %v1890_v58 = vsel %vm1528_vm5, %v1888_v61, %v1889_v60 }
 0x268   :  { %v1419_v49 = vpop.f32.mrf.mxu0  ;;  %2296 = vmatmul.msk.f32.vlgmr.msra.gmra.mxu3 %vm1719_vm7, %v1698_v0  ;;  %2328 = vmatmul.msk.f32.vlgmr.msra.gmra.mxu1 %vm1719_vm7, %v1890_v58 }
 0x269   :  { %v1649_v27 = vadd.f32 %v3261_v59, %v1633_v2  ;;  %v1497_v28 = vadd.f32 %v1496_v15, %v1419_v49 }
 0x26b   :  { %v1661_v53 = vmax.f32 %v1649_v27, 0.0 }
 0x26d   :  { %v1699_v42 = vrot.slane %v1661_v53, 1  ;;  %v1891_v3 = vrot.slane %v1661_v53, 2  ;;  %2311 = vmatmul.msk.f32.gmra.mxu0 %vm1719_vm7, %v1661_v53  ;;  %v1502_v7 = vpop.f32.mrf.mxu1 }
 0x26e   :  { %v1604_v57 = vpop.f32.mrf.mxu2 }
 0x26f   :  { %v1634_v25 = vadd.f32 %v1604_v57, %v1497_v28  ;;  %v1700_v29 = vsel %vm290_vm2, %v1697_v36, %v1699_v42  ;;  %v1892_v5 = vsel %vm1528_vm5, %v1889_v60, %v1891_v3 }
 0x270   :  { %v1422_v44 = vpop.f32.mrf.mxu0  ;;  %2297 = vmatmul.msk.f32.gmra.mxu3 %vm1719_vm7, %v1700_v29  ;;  %2329 = vmatmul.msk.f32.gmra.mxu1 %vm1719_vm7, %v1892_v5 }
 0x271   :  { %v1650_v63 = vadd.f32 %v3261_v59, %v1634_v25  ;;  %v1500_v6 = vadd.f32 %v1499_v9, %v1422_v44 }
 0x273   :  { %v1662_v10 = vmax.f32 %v1650_v63, 0.0 }
 0x275   :  { %v1701_v12 = vrot.slane %v1662_v10, 1  ;;  %v1893_v13 = vrot.slane %v1662_v10, 2  ;;  %2312 = vmatmul.msk.f32.gmra.mxu0 %vm1719_vm7, %v1662_v10  ;;  %v1505_v23 = vpop.f32.mrf.mxu1 }
 0x276   :  { %v1607_v14 = vpop.f32.mrf.mxu2 }
 0x277   :  { %v1635_v18 = vadd.f32 %v1607_v14, %v1500_v6  ;;  %v1702_v33 = vsel %vm290_vm2, %v1699_v42, %v1701_v12  ;;  %v1894_v45 = vsel %vm1528_vm5, %v1891_v3, %v1893_v13 }
 0x278   :  { %v1425_v50 = vpop.f32.mrf.mxu0  ;;  %2298 = vmatmul.msk.f32.gmra.mxu3 %vm1719_vm7, %v1702_v33  ;;  %2330 = vmatmul.msk.f32.gmra.mxu1 %vm1719_vm7, %v1894_v45 }
 0x279   :  { %v1651_v41 = vadd.f32 %v3261_v59, %v1635_v18  ;;  %v1503_v35 = vadd.f32 %v1502_v7, %v1425_v50 }
 0x27b   :  { %v1663_v20 = vmax.f32 %v1651_v41, 0.0 }
 0x27d   :  { %v1703_v46 = vrot.slane %v1663_v20, 1  ;;  %v1895_v31 = vrot.slane %v1663_v20, 2  ;;  %2313 = vmatmul.msk.f32.gmra.mxu0 %vm1719_vm7, %v1663_v20  ;;  %v1508_v30 = vpop.f32.mrf.mxu1 }
 0x27e   :  { %v1610_v22 = vpop.f32.mrf.mxu2 }
 0x27f   :  { %v1636_v24 = vadd.f32 %v1610_v22, %v1503_v35  ;;  %v1704_v16 = vsel %vm290_vm2, %v1701_v12, %v1703_v46  ;;  %v1896_v43 = vsel %vm1528_vm5, %v1893_v13, %v1895_v31 }
 0x280   :  { %v1428_v17 = vpop.f32.mrf.mxu0  ;;  %2299 = vmatmul.msk.f32.gmra.mxu3 %vm1719_vm7, %v1704_v16  ;;  %2331 = vmatmul.msk.f32.gmra.mxu1 %vm1719_vm7, %v1896_v43 }
 0x281   :  { %v1652_v11 = vadd.f32 %v3261_v59, %v1636_v24  ;;  %v1506_v62 = vadd.f32 %v1505_v23, %v1428_v17 }
 0x283   :  { %v1664_v37 = vmax.f32 %v1652_v11, 0.0 }
 0x285   :  { %v1705_v34 = vrot.slane %v1664_v37, 1  ;;  %v1897_v56 = vrot.slane %v1664_v37, 2  ;;  %2314 = vmatmul.msk.f32.gmra.mxu0 %vm1719_vm7, %v1664_v37  ;;  %v1511_v51 = vpop.f32.mrf.mxu1 }
 0x286   :  { %v1613_v26 = vpop.f32.mrf.mxu2 }
 0x287   :  { %v1637_v40 = vadd.f32 %v1613_v26, %v1506_v62  ;;  %v1706_v32 = vsel %vm290_vm2, %v1703_v46, %v1705_v34  ;;  %v1898_v38 = vsel %vm1528_vm5, %v1895_v31, %v1897_v56 }
 0x288   :  { %v1431_v8 = vpop.f32.mrf.mxu0  ;;  %2300 = vmatmul.msk.f32.gmra.mxu3 %vm1719_vm7, %v1706_v32  ;;  %2332 = vmatmul.msk.f32.gmra.mxu1 %vm1719_vm7, %v1898_v38 }
 0x289   :  { %v1653_v47 = vadd.f32 %v3261_v59, %v1637_v40  ;;  %v1509_v48 = vadd.f32 %v1508_v30, %v1431_v8 }
 0x28b   :  { %v1665_v4 = vmax.f32 %v1653_v47, 0.0 }
 0x28d   :  { %v1707_v52 = vrot.slane %v1665_v4, 1  ;;  %v1899_v15 = vrot.slane %v1665_v4, 2  ;;  %2315 = vmatmul.msk.f32.gmra.mxu0 %vm1719_vm7, %v1665_v4  ;;  %v1514_v27 = vpop.f32.mrf.mxu1 }
 0x28e   :  { %v1616_v39 = vpop.f32.mrf.mxu2 }
 0x28f   :  { %v1638_v19 = vadd.f32 %v1616_v39, %v1509_v48  ;;  %v1708_v54 = vsel %vm290_vm2, %v1705_v34, %v1707_v52  ;;  %v1900_v21 = vsel %vm1528_vm5, %v1897_v56, %v1899_v15 }
 0x290   :  { %v1434_v61 = vpop.f32.mrf.mxu0  ;;  %2301 = vmatmul.msk.f32.gmra.mxu3 %vm1719_vm7, %v1708_v54  ;;  %2333 = vmatmul.msk.f32.gmra.mxu1 %vm1719_vm7, %v1900_v21 }
 0x291   :  { %v1654_v36 = vadd.f32 %v3261_v59, %v1638_v19  ;;  %v1512_v55 = vadd.f32 %v1511_v51, %v1434_v61 }
 0x293   :  { %v1666_v60 = vmax.f32 %v1654_v36, 0.0 }
 0x295   :  { %v1709_v1 = vrot.slane %v1666_v60, 1  ;;  %v1901_v9 = vrot.slane %v1666_v60, 2  ;;  %2316 = vmatmul.msk.f32.gmra.mxu0 %vm1719_vm7, %v1666_v60  ;;  %v1517_v12 = vpop.f32.mrf.mxu1 }
 0x296   :  { %v1619_v2 = vpop.f32.mrf.mxu2 }
 0x297   :  { %v1639_v0 = vadd.f32 %v1619_v2, %v1512_v55  ;;  %v1710_v58 = vsel %vm290_vm2, %v1707_v52, %v1709_v1  ;;  %v1902_v49 = vsel %vm1528_vm5, %v1899_v15, %v1901_v9 }
 0x298   :  { %v1437_v53 = vpop.f32.mrf.mxu0  ;;  %2302 = vmatmul.msk.f32.gmra.mxu3 %vm1719_vm7, %v1710_v58  ;;  %2334 = vmatmul.msk.f32.gmra.mxu1 %vm1719_vm7, %v1902_v49 }
 0x299   :  { %v1655_v42 = vadd.f32 %v3261_v59, %v1639_v0  ;;  %v1515_v25 = vadd.f32 %v1514_v27, %v1437_v53 }
 0x29b   :  { %v1667_v3 = vmax.f32 %v1655_v42, 0.0 }
 0x29d   :  { %v1711_v28 = vrot.slane %v1667_v3, 1  ;;  %v1903_v57 = vrot.slane %v1667_v3, 2  ;;  %2317 = vmatmul.msk.f32.gmra.mxu0 %vm1719_vm7, %v1667_v3  ;;  %v1520_v31 = vpop.f32.mrf.mxu1 }
 0x29e   :  { %v1622_v29 = vpop.f32.mrf.mxu2 }
 0x29f   :  { %v1640_v5 = vadd.f32 %v1622_v29, %v1515_v25  ;;  %v1712_v7 = vsel %vm290_vm2, %v1709_v1, %v1711_v28  ;;  %v1904_v44 = vsel %vm1528_vm5, %v1901_v9, %v1903_v57 }
 0x2a0   :  { %v1440_v63 = vpop.f32.mrf.mxu0  ;;  %2303 = vmatmul.msk.f32.gmra.mxu3 %vm1719_vm7, %v1712_v7  ;;  %2335 = vmatmul.msk.f32.gmra.mxu1 %vm1719_vm7, %v1904_v44 }
 0x2a1   :  { %v1656_v10 = vadd.f32 %v3261_v59, %v1640_v5  ;;  %v1518_v18 = vadd.f32 %v1517_v12, %v1440_v63 }
 0x2a3   :  { %v1668_v13 = vmax.f32 %v1656_v10, 0.0 }
 0x2a5   :  { %v1713_v6 = vrot.slane %v1668_v13, 1  ;;  %v1905_v14 = vrot.slane %v1668_v13, 2  ;;  %2318 = vmatmul.msk.f32.gmra.mxu0 %vm1719_vm7, %v1668_v13 }
 0x2a6   :  { %v1625_v33 = vpop.f32.mrf.mxu2 }
 0x2a7   :  { %v1641_v45 = vadd.f32 %v1625_v33, %v1518_v18  ;;  %v1714_v50 = vsel %vm290_vm2, %v1711_v28, %v1713_v6  ;;  %v1906_v41 = vsel %vm1528_vm5, %v1903_v57, %v1905_v14 }
 0x2a8   :  { %2304 = vmatmul.msk.f32.gmra.mxu3 %vm1719_vm7, %v1714_v50  ;;  %2336 = vmatmul.msk.f32.gmra.mxu1 %vm1719_vm7, %v1906_v41  ;;  %v1443_v20 = vpop.f32.mrf.mxu0 }
 0x2a9   :  { %v1657_v23 = vadd.f32 %v3261_v59, %v1641_v45  ;;  %v1521_v24 = vadd.f32 %v1520_v31, %v1443_v20 }
 0x2ab   :  { %v1669_v46 = vmax.f32 %v1657_v23, 0.0  ;;  %v2354_v23 = vld [vmem:[#allocation2] ss:$0 sm:$0xff] }
 0x2ad   :  { %v1715_v35 = vrot.slane %v1669_v46, 1  ;;  %v1907_v22 = vrot.slane %v1669_v46, 2  ;;  %2319 = vmatmul.msk.f32.gmra.mxu0 %vm1719_vm7, %v1669_v46 }
 0x2ae   :  { %v1628_v16 = vpop.f32.mrf.mxu2 }
 0x2af   :  { %v1642_v43 = vadd.f32 %v1628_v16, %v1521_v24  ;;  %v1716_v17 = vsel %vm290_vm2, %v1713_v6, %v1715_v35  ;;  %v1908_v11 = vsel %vm1528_vm5, %v1905_v14, %v1907_v22 }
 0x2b0   :  { %2305 = vmatmul.msk.f32.gmra.mxu3 %vm1719_vm7, %v1716_v17  ;;  %2337 = vmatmul.msk.f32.gmra.mxu1 %vm1719_vm7, %v1908_v11  ;;  %v2353_v17 = vld [vmem:[%s3364_s9] ss:$0 sm:$0xff] }
 0x2b1   :  { %v1658_v37 = vadd.f32 %v3261_v59, %v1642_v43 }
 0x2b3   :  { %v1670_v30 = vmax.f32 %v1658_v37, 0.0 }
 0x2b5   :  { %v1717_v34 = vrot.slane %v1670_v30, 1  ;;  %v1909_v56 = vrot.slane %v1670_v30, 2  ;;  %2320 = vmatmul.msk.f32.gmra.mxu0 %vm1719_vm7, %v1670_v30 }
 0x2b7   :  { %v1718_v62 = vsel %vm290_vm2, %v1715_v35, %v1717_v34  ;;  %v1910_v26 = vsel %vm1528_vm5, %v1907_v22, %v1909_v56  ;;  %v2410_v35 = vmov 0  }
 0x2b8   :  { %2306 = vmatmul.msk.f32.gmra.mxu3 %vm1719_vm7, %v1718_v62  ;;  %2338 = vmatmul.msk.f32.gmra.mxu1 %vm1719_vm7, %v1910_v26 }
 0x2b9   :  { %2349 = vset.pattern.permute.xlu0 %v2410_v35 }
 0x2ba   :  { %2036 = vperm.xlu0 %2349, %v2354_v23  }
 0x2c0   :  { %2307 = vmatmul.msk.f32.gmra.mxu3 %vm1719_vm7, %v1717_v34  ;;  %2339 = vmatmul.msk.f32.gmra.mxu1 %vm1719_vm7, %v1909_v56 }
 0x2da   :  { %v1845_v40 = vpop.f32.mrf.mxu0 }
 0x2e2   :  { %v1848_v32 = vpop.f32.mrf.mxu0 }
 0x2e5   :  { %v1955_v59 = vpop.f32.mrf.mxu1 }
 0x2ea   :  { %v1851_v38 = vpop.f32.mrf.mxu0 }
 0x2eb   :  { %v1765_v8 = vpop.f32.mrf.mxu3 }
 0x2ec   :  { %v1846_v47 = vadd.f32 %v1845_v40, %v1765_v8 }
 0x2ed   :  { %v1958_v4 = vpop.f32.mrf.mxu1 }
 0x2ee   :  { %v3333_v52 = vadd.f32 %v1955_v59, %v1846_v47 }
 0x2f2   :  { %v1854_v15 = vpop.f32.mrf.mxu0 }
 0x2f3   :  { %v1768_v48 = vpop.f32.mrf.mxu3 }
 0x2f4   :  { %v1849_v51 = vadd.f32 %v1848_v32, %v1768_v48 }
 0x2f5   :  { %v1961_v39 = vpop.f32.mrf.mxu1 }
 0x2f6   :  { %v3335_v19 = vadd.f32 %v1958_v4, %v1849_v51 }
 0x2fa   :  { %v1857_v61 = vpop.f32.mrf.mxu0 }
 0x2fb   :  { %v1771_v54 = vpop.f32.mrf.mxu3 }
 0x2fc   :  { %v1852_v21 = vadd.f32 %v1851_v38, %v1771_v54 }
 0x2fd   :  { %v1964_v36 = vpop.f32.mrf.mxu1 }
 0x2fe   :  { %v3337_v60 = vadd.f32 %v1961_v39, %v1852_v21 }
 0x302   :  { %v1860_v0 = vpop.f32.mrf.mxu0 }
 0x303   :  { %v1774_v1 = vpop.f32.mrf.mxu3 }
 0x304   :  { %v1855_v9 = vadd.f32 %v1854_v15, %v1774_v1 }
 0x305   :  { %v1967_v55 = vpop.f32.mrf.mxu1 }
 0x306   :  { %v3339_v2 = vadd.f32 %v1964_v36, %v1855_v9  ;;  %v2009_v9 = vadd.f32 %v2353_v17, %v3337_v60 }
 0x308   :  { %v2010_v36 = vadd.f32 %v2353_v17, %v3339_v2  ;;  %v2031_v2 = vld [vmem:[%s3365_s10] sm:$0x3] }
 0x30a   :  { %v1863_v42 = vpop.f32.mrf.mxu0 }
 0x30b   :  { %v1777_v58 = vpop.f32.mrf.mxu3 }
 0x30c   :  { %v1858_v49 = vadd.f32 %v1857_v61, %v1777_v58  ;;  %v2021_v58 = vmax.f32 %v2009_v9, 0.0 }
 0x30d   :  { %v1970_v27 = vpop.f32.mrf.mxu1 }
 0x30e   :  { %v1995_v53 = vadd.f32 %v1967_v55, %v1858_v49  ;;  %v2022_v55 = vmax.f32 %v2010_v36, 0.0  ;;  %v2007_v49 = vadd.f32 %v2353_v17, %v3333_v52 }
 0x310   :  { %v2011_v21 = vadd.f32 %v2353_v17, %v1995_v53  ;;  %v2019_v53 = vmax.f32 %v2007_v49, 0.0 }
 0x312   :  { %v1866_v57 = vpop.f32.mrf.mxu0  ;;  %v2023_v1 = vmax.f32 %v2011_v21, 0.0 }
 0x313   :  { %v1780_v3 = vpop.f32.mrf.mxu3 }
 0x314   :  { %v1861_v56 = vadd.f32 %v1860_v0, %v1780_v3  ;;  %v2008_v0 = vadd.f32 %v2353_v17, %v3335_v19 }
 0x315   :  { %v1973_v28 = vpop.f32.mrf.mxu1 }
 0x316   :  { %v1996_v8 = vadd.f32 %v1970_v27, %v1861_v56  ;;  %v2020_v27 = vmax.f32 %v2008_v0, 0.0 }
 0x318   :  { %v2012_v39 = vadd.f32 %v2353_v17, %v1996_v8 }
 0x31a   :  { %v1869_v7 = vpop.f32.mrf.mxu0  ;;  %v2024_v61 = vmax.f32 %v2012_v39, 0.0 }
 0x31b   :  { %v1783_v25 = vpop.f32.mrf.mxu3 }
 0x31c   :  { %v1864_v11 = vadd.f32 %v1863_v42, %v1783_v25 }
 0x31d   :  { %v1976_v29 = vpop.f32.mrf.mxu1 }
 0x31e   :  { %v1997_v32 = vadd.f32 %v1973_v28, %v1864_v11 }
 0x320   :  { %v2013_v48 = vadd.f32 %v2353_v17, %v1997_v32 }
 0x322   :  { %v1872_v10 = vpop.f32.mrf.mxu0  ;;  %v2025_v54 = vmax.f32 %v2013_v48, 0.0 }
 0x323   :  { %v1786_v5 = vpop.f32.mrf.mxu3 }
 0x324   :  { %v1867_v24 = vadd.f32 %v1866_v57, %v1786_v5 }
 0x325   :  { %v1979_v44 = vpop.f32.mrf.mxu1 }
 0x326   :  { %v1998_v62 = vadd.f32 %v1976_v29, %v1867_v24 }
 0x328   :  { %v2014_v4 = vadd.f32 %v2353_v17, %v1998_v62 }
 0x32a   :  { %v1875_v6 = vpop.f32.mrf.mxu0  ;;  %v2026_v51 = vmax.f32 %v2014_v4, 0.0 }
 0x32b   :  { %v1789_v63 = vpop.f32.mrf.mxu3 }
 0x32c   :  { %v1870_v20 = vadd.f32 %v1869_v7, %v1789_v63  ;;  %v2037_v60 = vpop.permute.xlu0 %2036 }
 0x32d   :  { %v1982_v12 = vpop.f32.mrf.mxu1 }
 0x32e   :  { %v1999_v37 = vadd.f32 %v1979_v44, %v1870_v20 }
 0x330   :  { %v2015_v38 = vadd.f32 %v2353_v17, %v1999_v37 }
 0x332   :  { %v1878_v50 = vpop.f32.mrf.mxu0  ;;  %v2027_v15 = vmax.f32 %v2015_v38, 0.0 }
 0x333   :  { %v1792_v13 = vpop.f32.mrf.mxu3 }
 0x334   :  { %v1873_v45 = vadd.f32 %v1872_v10, %v1792_v13 }
 0x335   :  { %v1985_v14 = vpop.f32.mrf.mxu1 }
 0x336   :  { %v2000_v16 = vadd.f32 %v1982_v12, %v1873_v45 }
 0x338   :  { %v2016_v40 = vadd.f32 %v2353_v17, %v2000_v16 }
 0x33a   :  { %v2028_v47 = vmax.f32 %v2016_v40, 0.0 }
 0x33b   :  { %v1795_v18 = vpop.f32.mrf.mxu3 }
 0x33c   :  { %v1876_v33 = vadd.f32 %v1875_v6, %v1795_v18 }
 0x33d   :  { %v1988_v22 = vpop.f32.mrf.mxu1 }
 0x33e   :  { %v2001_v46 = vadd.f32 %v1985_v14, %v1876_v33 }
 0x340   :  { %v2017_v34 = vadd.f32 %v2353_v17, %v2001_v46 }
 0x342   :  { %v2029_v59 = vmax.f32 %v2017_v34, 0.0 }
 0x343   :  { %v1798_v41 = vpop.f32.mrf.mxu3 }
 0x344   :  { %v1879_v31 = vadd.f32 %v1878_v50, %v1798_v41 }
 0x346   :  { %v2002_v43 = vadd.f32 %v1988_v22, %v1879_v31 }
 0x348   :  { %v2018_v30 = vadd.f32 %v2353_v17, %v2002_v43 }
 0x34a   :  { %v2030_v26 = vmax.f32 %v2018_v30, 0.0 }
 0x34c   :  { %2340 = vmatpush.msk.msrb.mxu2 %vm1528_vm5, %v2030_v26 }
 0x34e   :  { %2051 = vmatpush.msrb.mxu2 %v2029_v59 }
 0x350   :  { %2052 = vmatpush.msrb.mxu2 %v2028_v47 }
 0x352   :  { %2053 = vmatpush.msrb.mxu2 %v2027_v15 }
 0x354   :  { %2054 = vmatpush.msrb.mxu2 %v2026_v51 }
 0x356   :  { %2055 = vmatpush.msrb.mxu2 %v2025_v54 }
 0x358   :  { %2056 = vmatpush.msrb.mxu2 %v2024_v61 }
 0x35a   :  { %2057 = vmatpush.msrb.mxu2 %v2023_v1 }
 0x35c   :  { %2058 = vmatpush.msrb.mxu2 %v2022_v55 }
 0x35e   :  { %2059 = vmatpush.msrb.mxu2 %v2021_v58 }
 0x360   :  { %2060 = vmatpush.msrb.mxu2 %v2020_v27 }
 0x362   :  { %2061 = vmatpush.msrb.mxu2 %v2019_v53 }
 0x363   :  { %2341 = vmatmul.msk.f32.vlgmr.msrb.gmra.mxu2 %vm2039_vm8, %v2031_v2 }
 0x3e6   :  { %v2063_v19 = vpop.f32.mrf.mxu2 }
 0x3e7   :  { %v2064_v52 = vadd.f32 %v2063_v19, %v2037_v60 }
 0x3e9   :  { %2067 = vst.msk [vmem:[#allocation6] sm:$0x3] %vm2066_vm9, %v2064_v52 }
 0x3ea   :  { %2078 = dma.vmem_to_hbm [thread:$0]  %s2074_s28, 32, %s2076_s11, [#allocation5]  }
 0x3eb   :  { %2405 = dma.done.wait [#allocation5], 32  }
 0x3ec   :  { %2406 = vsyncadd [#allocation5], 4294967264 }
 0x3ed   :  { %2083 = vsyncpa [#allocation4], 1 }
 0x3ee   :  { %2084 = vsyncpa [#allocation5], 1 }

</bundles_post_ra>
